<compile_context>
chip_gen: v7x
topology: tpu7x:2x2x1
jax: 0.10.0
libtpu: 0.0.40
codegen_flags: <defaults>
</compile_context>

<pallas_src>
import functools
import math

import jax
import jax.numpy as jnp
from jax.experimental import pallas as pl
from jax.experimental.pallas import tpu as pltpu


def _layernorm(y, gamma, beta, eps=1e-5):
    mu = jnp.mean(y, axis=-1, keepdims=True)
    var = jnp.mean((y - mu) ** 2, axis=-1, keepdims=True)
    return (y - mu) * jax.lax.rsqrt(var + eps) * gamma + beta


def patchtst_kernel(h0_ref,
                    wq_ref, wk_ref, wv_ref, bq_ref, bk_ref, bv_ref,
                    ow_ref, ob_ref, ln1_g_ref, ln1_b_ref,
                    ff1_w_ref, ff1_b_ref, ff2_w_ref, ff2_b_ref,
                    ln2_g_ref, ln2_b_ref,
                    o_ref, *, num_heads):
    l = pl.program_id(1)

    BB, S, d_model = o_ref.shape
    M = BB * S
    H = num_heads
    dh = d_model // H
    scale = 1.0 / math.sqrt(dh)

    # ---- initialize the resident activation with the embedded input (layer 0) ----
    @pl.when(l == 0)
    def _():
        o_ref[...] = h0_ref[...]

    h = o_ref[...].reshape(M, d_model)        # f32 resident activation
    hb = h.astype(jnp.bfloat16)               # bf16 operand for all MXU matmuls

    # ---- self-attention block (post-norm TransformerEncoderLayer, eval mode) ----
    ow_bias = ob_ref[...]
    attn = jnp.zeros((M, d_model), jnp.float32)
    for hh in range(H):                       # small static head loop (unrolled)
        # per-head projections: weights are head-major Refs -> leading-axis index,
        # no lane slicing of activation values.
        qh = jnp.dot(hb, wq_ref[hh], preferred_element_type=jnp.float32) + bq_ref[hh]
        kh = jnp.dot(hb, wk_ref[hh], preferred_element_type=jnp.float32) + bk_ref[hh]
        vh = jnp.dot(hb, wv_ref[hh], preferred_element_type=jnp.float32) + bv_ref[hh]
        qh3 = qh.reshape(BB, S, dh).astype(jnp.bfloat16)
        kh3 = kh.reshape(BB, S, dh).astype(jnp.bfloat16)
        vh3 = vh.reshape(BB, S, dh).astype(jnp.bfloat16)

        s = jnp.einsum('bqd,bkd->bqk', qh3, kh3,
                       preferred_element_type=jnp.float32) * scale
        s = s - jnp.max(s, axis=-1, keepdims=True)
        e = jnp.exp(s)
        p = e * pl.reciprocal(jnp.sum(e, axis=-1, keepdims=True), approx=True)
        oh = jnp.einsum('bqk,bkd->bqd', p.astype(jnp.bfloat16), vh3,
                        preferred_element_type=jnp.float32)          # (BB, S, dh)

        # fold the head directly into the output projection via the head-major
        # (dh, D) weight slab -- no lane-axis concat of head outputs.
        attn = attn + jnp.dot(oh.reshape(M, dh).astype(jnp.bfloat16), ow_ref[hh],
                              preferred_element_type=jnp.float32)
    attn = attn + ow_bias
    h = _layernorm(h + attn, ln1_g_ref[...], ln1_b_ref[...])

    # ---- feed-forward block (ReLU) ----
    ff = jnp.dot(h.astype(jnp.bfloat16), ff1_w_ref[...],
                 preferred_element_type=jnp.float32) + ff1_b_ref[...]
    ff = jnp.maximum(ff, 0.0)
    ff = jnp.dot(ff.astype(jnp.bfloat16), ff2_w_ref[...],
                 preferred_element_type=jnp.float32) + ff2_b_ref[...]
    h = _layernorm(h + ff, ln2_g_ref[...], ln2_b_ref[...])

    o_ref[...] = h.reshape(BB, S, d_model)


def _pick_batch_block(B, S, max_rows=2048):
    """Largest divisor BB of B with BB*S <= max_rows.  Prefer nb=B/BB >= 2 (v7x
    megacore sharding of the parallel batch axis) unless that would starve the
    MXU row dimension (BB*S < 256)."""
    divisors = [d for d in range(1, B + 1) if B % d == 0 and d * S <= max_rows]
    if not divisors:
        return 1
    pref = [d for d in divisors if (B // d) >= 2 and d * S >= 256]
    return max(pref) if pref else max(divisors)


def patchtst_forward(x, params, *, num_layers, num_heads, batch_block=None):
    B, S, _ = x.shape
    d_model = params['emb_w'].shape[1]
    dff = params['ff1_w'].shape[2]
    L = num_layers
    H = num_heads
    assert d_model % H == 0
    dh = d_model // H

    if batch_block is None:
        batch_block = _pick_batch_block(B, S)
    BB = batch_block
    assert B % BB == 0, "batch_block must divide batch size"
    nb = B // BB

    # ---- embedding + positional encoding in XLA (K = input_dim is MXU-hostile) ----
    h0 = (jnp.einsum('bsi,id->bsd', x, params['emb_w'])
          + params['emb_b'] + params['pos']).astype(jnp.float32)

    # ---- head-major, bf16 weight layout for the kernel ----
    def to_heads_w(w):   # (L, D, D) -> (L, H, D, dh)
        return jnp.transpose(w.reshape(L, d_model, H, dh), (0, 2, 1, 3))

    def to_heads_b(b):   # (L, 1, D) -> (L, H, 1, dh)
        return jnp.transpose(b.reshape(L, 1, H, dh), (0, 2, 1, 3))

    wq = to_heads_w(params['wq']).astype(jnp.bfloat16)
    wk = to_heads_w(params['wk']).astype(jnp.bfloat16)
    wv = to_heads_w(params['wv']).astype(jnp.bfloat16)
    bq = to_heads_b(params['bq'])
    bk = to_heads_b(params['bk'])
    bv = to_heads_b(params['bv'])
    out_w = params['out_w'].reshape(L, H, dh, d_model).astype(jnp.bfloat16)
    ff1_w = params['ff1_w'].astype(jnp.bfloat16)
    ff2_w = params['ff2_w'].astype(jnp.bfloat16)

    def per_layer(tail):
        # (L, *tail) stack, streamed one layer at a time along the layer grid axis
        return pl.BlockSpec((None,) + tail,
                            lambda b, l, _n=len(tail): (l,) + (0,) * _n)

    kernel = functools.partial(patchtst_kernel, num_heads=H)

    return pl.pallas_call(
        kernel,
        out_shape=jax.ShapeDtypeStruct((B, S, d_model), jnp.float32),
        grid=(nb, L),
        in_specs=[
            pl.BlockSpec((BB, S, d_model), lambda b, l: (b, 0, 0)),  # h0 (batch block)
            per_layer((H, d_model, dh)),                             # wq
            per_layer((H, d_model, dh)),                             # wk
            per_layer((H, d_model, dh)),                             # wv
            per_layer((H, 1, dh)),                                   # bq
            per_layer((H, 1, dh)),                                   # bk
            per_layer((H, 1, dh)),                                   # bv
            per_layer((H, dh, d_model)),                             # out_w (head-major)
            per_layer((1, d_model)),                                 # out_b
            per_layer((1, d_model)),                                 # ln1_g
            per_layer((1, d_model)),                                 # ln1_b
            per_layer((d_model, dff)),                               # ff1_w
            per_layer((1, dff)),                                     # ff1_b
            per_layer((dff, d_model)),                               # ff2_w
            per_layer((1, d_model)),                                 # ff2_b
            per_layer((1, d_model)),                                 # ln2_g
            per_layer((1, d_model)),                                 # ln2_b
        ],
        # resident output block = activation accumulator across the layer axis
        out_specs=pl.BlockSpec((BB, S, d_model), lambda b, l: (b, 0, 0)),
        compiler_params=pltpu.CompilerParams(
            dimension_semantics=("parallel", "arbitrary"),
            vmem_limit_bytes=40 * 1024 * 1024),
    )(h0, wq, wk, wv, bq, bk, bv, out_w, params['out_b'],
      params['ln1_g'], params['ln1_b'],
      ff1_w, params['ff1_b'], ff2_w, params['ff2_b'],
      params['ln2_g'], params['ln2_b'])


def init_params(key, input_dim, d_model, dim_feedforward, num_layers):
    ks = jax.random.split(key, 15)
    s = 0.1
    L = num_layers
    return {
        'emb_w': jax.random.normal(ks[0], (input_dim, d_model), jnp.float32) * s,
        'emb_b': jax.random.normal(ks[1], (1, d_model), jnp.float32) * s,
        'pos':   jax.random.normal(ks[2], (1, d_model), jnp.float32),
        'wq':    jax.random.normal(ks[3], (L, d_model, d_model), jnp.float32) * s,
        'wk':    jax.random.normal(ks[4], (L, d_model, d_model), jnp.float32) * s,
        'wv':    jax.random.normal(ks[5], (L, d_model, d_model), jnp.float32) * s,
        'bq':    jax.random.normal(ks[6], (L, 1, d_model), jnp.float32) * s,
        'bk':    jax.random.normal(ks[7], (L, 1, d_model), jnp.float32) * s,
        'bv':    jax.random.normal(ks[8], (L, 1, d_model), jnp.float32) * s,
        'out_w': jax.random.normal(ks[9], (L, d_model, d_model), jnp.float32) * s,
        'out_b': jax.random.normal(ks[10], (L, 1, d_model), jnp.float32) * s,
        'ln1_g': jnp.ones((L, 1, d_model), jnp.float32),
        'ln1_b': jnp.zeros((L, 1, d_model), jnp.float32),
        'ff1_w': jax.random.normal(ks[11], (L, d_model, dim_feedforward), jnp.float32) * s,
        'ff1_b': jax.random.normal(ks[12], (L, 1, dim_feedforward), jnp.float32) * s,
        'ff2_w': jax.random.normal(ks[13], (L, dim_feedforward, d_model), jnp.float32) * s,
        'ff2_b': jax.random.normal(ks[14], (L, 1, d_model), jnp.float32) * s,
        'ln2_g': jnp.ones((L, 1, d_model), jnp.float32),
        'ln2_b': jnp.zeros((L, 1, d_model), jnp.float32),
    }


def reference_forward(x, params, *, num_layers, num_heads):
    """Pure-JAX f32 reference mirroring PyTorch's post-norm TransformerEncoder (eval)."""
    d_model = params['emb_w'].shape[1]
    dh = d_model // num_heads
    scale = 1.0 / math.sqrt(dh)
    # positional encoding is a (1, d_model) parameter broadcast over all positions,
    # exactly as in the PyTorch module spec.
    h = jnp.einsum('bsi,id->bsd', x, params['emb_w']) + params['emb_b'] + params['pos']
    B, S, _ = h.shape
    for l in range(num_layers):
        q = jnp.einsum('bsd,de->bse', h, params['wq'][l]) + params['bq'][l]
        k = jnp.einsum('bsd,de->bse', h, params['wk'][l]) + params['bk'][l]
        v = jnp.einsum('bsd,de->bse', h, params['wv'][l]) + params['bv'][l]
        q = q.reshape(B, S, num_heads, dh)
        k = k.reshape(B, S, num_heads, dh)
        v = v.reshape(B, S, num_heads, dh)
        sc = jnp.einsum('bqhd,bkhd->bhqk', q, k) * scale
        p = jax.nn.softmax(sc, axis=-1)
        o = jnp.einsum('bhqk,bkhd->bqhd', p, v).reshape(B, S, d_model)
        attn = jnp.einsum('bsd,de->bse', o, params['out_w'][l]) + params['out_b'][l]
        h = _layernorm(h + attn, params['ln1_g'][l], params['ln1_b'][l])
        ff = jax.nn.relu(jnp.einsum('bsd,de->bse', h, params['ff1_w'][l]) + params['ff1_b'][l])
        ff = jnp.einsum('bse,ed->bsd', ff, params['ff2_w'][l]) + params['ff2_b'][l]
        h = _layernorm(h + ff, params['ln2_g'][l], params['ln2_b'][l])
    return h


if __name__ == "__main__":
    # small shapes consistent with the Lorenz PatchTST backbone
    B, S = 2, 8
    input_dim, d_model, num_heads, dff, num_layers = 3, 32, 4, 64, 2

    key = jax.random.PRNGKey(0)
    kx, kp = jax.random.split(key)
    x = jax.random.normal(kx, (B, S, input_dim), jnp.float32)
    params = init_params(kp, input_dim, d_model, dff, num_layers)

    out = patchtst_forward(x, params, num_layers=num_layers, num_heads=num_heads)
    out = jax.block_until_ready(out)

    assert out.shape == (B, S, d_model)
    assert bool(jnp.all(jnp.isfinite(out)))

    ref = reference_forward(x, params, num_layers=num_layers, num_heads=num_heads)
    err = float(jnp.max(jnp.abs(out - ref)))
    if err > 5e-2:
        raise AssertionError(f"kernel/reference mismatch: max abs err = {err}")

    print("KERNEL_OK")
</pallas_src>

<mosaic_0001>
module attributes {stable_mosaic.version = 11 : i64} {
  func.func @patchtst_kernel(%arg0: i32, %arg1: i32, %arg2: memref<2x8x32xf32, #tpu.memory_space<vmem>>, %arg3: memref<1x4x32x8xbf16, #tpu.memory_space<vmem>>, %arg4: memref<1x4x32x8xbf16, #tpu.memory_space<vmem>>, %arg5: memref<1x4x32x8xbf16, #tpu.memory_space<vmem>>, %arg6: memref<1x4x1x8xf32, #tpu.memory_space<vmem>>, %arg7: memref<1x4x1x8xf32, #tpu.memory_space<vmem>>, %arg8: memref<1x4x1x8xf32, #tpu.memory_space<vmem>>, %arg9: memref<1x4x8x32xbf16, #tpu.memory_space<vmem>>, %arg10: memref<1x1x32xf32, #tpu.memory_space<vmem>>, %arg11: memref<1x1x32xf32, #tpu.memory_space<vmem>>, %arg12: memref<1x1x32xf32, #tpu.memory_space<vmem>>, %arg13: memref<1x32x64xbf16, #tpu.memory_space<vmem>>, %arg14: memref<1x1x64xf32, #tpu.memory_space<vmem>>, %arg15: memref<1x64x32xbf16, #tpu.memory_space<vmem>>, %arg16: memref<1x1x32xf32, #tpu.memory_space<vmem>>, %arg17: memref<1x1x32xf32, #tpu.memory_space<vmem>>, %arg18: memref<1x1x32xf32, #tpu.memory_space<vmem>>, %arg19: memref<2x8x32xf32, #tpu.memory_space<vmem>>) attributes {dimension_semantics = [#tpu.dimension_semantics<parallel>, #tpu.dimension_semantics<arbitrary>], iteration_bounds = array<i64: 1, 2>, scalar_prefetch = 0 : i64, scratch_operands = 0 : i64, tpu.core_type = #tpu.core_type<tc>, window_params = [{transform_indices = @transform_0, window_bounds = array<i64: 2, 8, 32>}, {transform_indices = @transform_1, window_bounds = array<i64: 1, 4, 32, 8>}, {transform_indices = @transform_2, window_bounds = array<i64: 1, 4, 32, 8>}, {transform_indices = @transform_3, window_bounds = array<i64: 1, 4, 32, 8>}, {transform_indices = @transform_4, window_bounds = array<i64: 1, 4, 1, 8>}, {transform_indices = @transform_5, window_bounds = array<i64: 1, 4, 1, 8>}, {transform_indices = @transform_6, window_bounds = array<i64: 1, 4, 1, 8>}, {transform_indices = @transform_7, window_bounds = array<i64: 1, 4, 8, 32>}, {transform_indices = @transform_8, window_bounds = array<i64: 1, 1, 32>}, {transform_indices = @transform_9, window_bounds = array<i64: 1, 1, 32>}, {transform_indices = @transform_10, window_bounds = array<i64: 1, 1, 32>}, {transform_indices = @transform_11, window_bounds = array<i64: 1, 32, 64>}, {transform_indices = @transform_12, window_bounds = array<i64: 1, 1, 64>}, {transform_indices = @transform_13, window_bounds = array<i64: 1, 64, 32>}, {transform_indices = @transform_14, window_bounds = array<i64: 1, 1, 32>}, {transform_indices = @transform_15, window_bounds = array<i64: 1, 1, 32>}, {transform_indices = @transform_16, window_bounds = array<i64: 1, 1, 32>}, {transform_indices = @transform_17, window_bounds = array<i64: 2, 8, 32>}]} {
    %c0_i32 = arith.constant 0 : i32
    %0 = arith.cmpi eq, %arg1, %c0_i32 : i32
    %1 = arith.extui %0 : i1 to i32
    %c0_i32_0 = arith.constant 0 : i32
    %2 = arith.cmpi ne, %1, %c0_i32_0 : i32
    scf.if %2 {
      %c0_191 = arith.constant 0 : index
      %c0_192 = arith.constant 0 : index
      %c0_193 = arith.constant 0 : index
      %277 = vector.load %arg2[%c0_191, %c0_192, %c0_193] : memref<2x8x32xf32, #tpu.memory_space<vmem>>, vector<2x8x32xf32>
      %c0_194 = arith.constant 0 : index
      %c0_195 = arith.constant 0 : index
      %c0_196 = arith.constant 0 : index
      %278 = vector.load %arg19[%c0_194, %c0_195, %c0_196] : memref<2x8x32xf32, #tpu.memory_space<vmem>>, vector<2x8x32xf32>
      tpu.vector_store %arg19[%c0_194, %c0_195, %c0_196], %277 {strides = array<i32>} : memref<2x8x32xf32, #tpu.memory_space<vmem>>, vector<2x8x32xf32>,
    } else {
    }
    %c0 = arith.constant 0 : index
    %c0_1 = arith.constant 0 : index
    %c0_2 = arith.constant 0 : index
    %3 = vector.load %arg19[%c0, %c0_1, %c0_2] : memref<2x8x32xf32, #tpu.memory_space<vmem>>, vector<2x8x32xf32>
    %4 = vector.shape_cast %3 : vector<2x8x32xf32> to vector<16x32xf32>
    %5 = arith.truncf %4 : vector<16x32xf32> to vector<16x32xbf16>
    %c0_3 = arith.constant 0 : index
    %c0_4 = arith.constant 0 : index
    %c0_5 = arith.constant 0 : index
    %6 = vector.load %arg10[%c0_3, %c0_4, %c0_5] : memref<1x1x32xf32, #tpu.memory_space<vmem>>, vector<1x1x32xf32>
    %7 = vector.shape_cast %6 : vector<1x1x32xf32> to vector<1x32xf32>
    %cst = arith.constant 0.000000e+00 : f32
    %8 = vector.broadcast %cst : f32 to vector<16x32xf32>
    %c0_6 = arith.constant 0 : index
    %c0_7 = arith.constant 0 : index
    %c0_8 = arith.constant 0 : index
    %c0_9 = arith.constant 0 : index
    %9 = vector.load %arg3[%c0_6, %c0_7, %c0_8, %c0_9] : memref<1x4x32x8xbf16, #tpu.memory_space<vmem>>, vector<1x1x32x8xbf16>
    %10 = vector.shape_cast %9 : vector<1x1x32x8xbf16> to vector<32x8xbf16>
    %cst_10 = arith.constant dense<0.000000e+00> : vector<16x8xf32>
    %11 = tpu.matmul %5, %10, %cst_10 {dimension_numbers = #tpu.dot_dimension_numbers<[1], [0], [0], [1], [0, 0, 1, 1], [], []>} : vector<16x32xbf16>, vector<32x8xbf16>, vector<16x8xf32> -> vector<16x8xf32>
    %c0_11 = arith.constant 0 : index
    %c0_12 = arith.constant 0 : index
    %c0_13 = arith.constant 0 : index
    %c0_14 = arith.constant 0 : index
    %12 = vector.load %arg6[%c0_11, %c0_12, %c0_13, %c0_14] : memref<1x4x1x8xf32, #tpu.memory_space<vmem>>, vector<1x1x1x8xf32>
    %13 = vector.shape_cast %12 : vector<1x1x1x8xf32> to vector<1x8xf32>
    %14 = vector.broadcast %13 : vector<1x8xf32> to vector<16x8xf32>
    %15 = arith.addf %11, %14 : vector<16x8xf32>
    %c0_15 = arith.constant 0 : index
    %c0_16 = arith.constant 0 : index
    %c0_17 = arith.constant 0 : index
    %c0_18 = arith.constant 0 : index
    %16 = vector.load %arg4[%c0_15, %c0_16, %c0_17, %c0_18] : memref<1x4x32x8xbf16, #tpu.memory_space<vmem>>, vector<1x1x32x8xbf16>
    %17 = vector.shape_cast %16 : vector<1x1x32x8xbf16> to vector<32x8xbf16>
    %cst_19 = arith.constant dense<0.000000e+00> : vector<16x8xf32>
    %18 = tpu.matmul %5, %17, %cst_19 {dimension_numbers = #tpu.dot_dimension_numbers<[1], [0], [0], [1], [0, 0, 1, 1], [], []>} : vector<16x32xbf16>, vector<32x8xbf16>, vector<16x8xf32> -> vector<16x8xf32>
    %c0_20 = arith.constant 0 : index
    %c0_21 = arith.constant 0 : index
    %c0_22 = arith.constant 0 : index
    %c0_23 = arith.constant 0 : index
    %19 = vector.load %arg7[%c0_20, %c0_21, %c0_22, %c0_23] : memref<1x4x1x8xf32, #tpu.memory_space<vmem>>, vector<1x1x1x8xf32>
    %20 = vector.shape_cast %19 : vector<1x1x1x8xf32> to vector<1x8xf32>
    %21 = vector.broadcast %20 : vector<1x8xf32> to vector<16x8xf32>
    %22 = arith.addf %18, %21 : vector<16x8xf32>
    %c0_24 = arith.constant 0 : index
    %c0_25 = arith.constant 0 : index
    %c0_26 = arith.constant 0 : index
    %c0_27 = arith.constant 0 : index
    %23 = vector.load %arg5[%c0_24, %c0_25, %c0_26, %c0_27] : memref<1x4x32x8xbf16, #tpu.memory_space<vmem>>, vector<1x1x32x8xbf16>
    %24 = vector.shape_cast %23 : vector<1x1x32x8xbf16> to vector<32x8xbf16>
    %cst_28 = arith.constant dense<0.000000e+00> : vector<16x8xf32>
    %25 = tpu.matmul %5, %24, %cst_28 {dimension_numbers = #tpu.dot_dimension_numbers<[1], [0], [0], [1], [0, 0, 1, 1], [], []>} : vector<16x32xbf16>, vector<32x8xbf16>, vector<16x8xf32> -> vector<16x8xf32>
    %c0_29 = arith.constant 0 : index
    %c0_30 = arith.constant 0 : index
    %c0_31 = arith.constant 0 : index
    %c0_32 = arith.constant 0 : index
    %26 = vector.load %arg8[%c0_29, %c0_30, %c0_31, %c0_32] : memref<1x4x1x8xf32, #tpu.memory_space<vmem>>, vector<1x1x1x8xf32>
    %27 = vector.shape_cast %26 : vector<1x1x1x8xf32> to vector<1x8xf32>
    %28 = vector.broadcast %27 : vector<1x8xf32> to vector<16x8xf32>
    %29 = arith.addf %25, %28 : vector<16x8xf32>
    %30 = vector.shape_cast %15 : vector<16x8xf32> to vector<2x8x8xf32>
    %31 = arith.truncf %30 : vector<2x8x8xf32> to vector<2x8x8xbf16>
    %32 = vector.shape_cast %22 : vector<16x8xf32> to vector<2x8x8xf32>
    %33 = arith.truncf %32 : vector<2x8x8xf32> to vector<2x8x8xbf16>
    %34 = vector.shape_cast %29 : vector<16x8xf32> to vector<2x8x8xf32>
    %35 = arith.truncf %34 : vector<2x8x8xf32> to vector<2x8x8xbf16>
    "tpu.trace_start"() <{level = 10 : i32, message = "bqd,bkd->bqk"}> : () -> ()
    %cst_33 = arith.constant dense<0.000000e+00> : vector<2x8x8xf32>
    %36 = tpu.matmul %31, %33, %cst_33 {dimension_numbers = #tpu.dot_dimension_numbers<[2], [2], [1], [1], [0, 0, 0, 1, 1, 1], [0], [0]>} : vector<2x8x8xbf16>, vector<2x8x8xbf16>, vector<2x8x8xf32> -> vector<2x8x8xf32>
    "tpu.trace_stop"() : () -> ()
    %cst_34 = arith.constant 0.353553385 : f32
    %37 = vector.broadcast %cst_34 : f32 to vector<2x8x8xf32>
    %38 = arith.mulf %36, %37 : vector<2x8x8xf32>
    %cst_35 = arith.constant dense<0xFF800000> : vector<2x8xf32>
    %39 = vector.multi_reduction <maximumf>, %38, %cst_35 [2] : vector<2x8x8xf32> to vector<2x8xf32>
    %40 = vector.shape_cast %39 : vector<2x8xf32> to vector<2x8x1xf32>
    %41 = vector.broadcast %40 : vector<2x8x1xf32> to vector<2x8x8xf32>
    %42 = arith.subf %38, %41 : vector<2x8x8xf32>
    %43 = math.exp %42 : vector<2x8x8xf32>
    %cst_36 = arith.constant dense<0.000000e+00> : vector<2x8xf32>
    %44 = vector.multi_reduction <add>, %43, %cst_36 [2] : vector<2x8x8xf32> to vector<2x8xf32>
    %45 = vector.shape_cast %44 : vector<2x8xf32> to vector<2x8x1xf32>
    %46 = tpu.reciprocal %45 {approx = true} : vector<2x8x1xf32> -> vector<2x8x1xf32>
    %47 = vector.broadcast %46 : vector<2x8x1xf32> to vector<2x8x8xf32>
    %48 = arith.mulf %43, %47 : vector<2x8x8xf32>
    %49 = arith.truncf %48 : vector<2x8x8xf32> to vector<2x8x8xbf16>
    "tpu.trace_start"() <{level = 10 : i32, message = "bqk,bkd->bqd"}> : () -> ()
    %cst_37 = arith.constant dense<0.000000e+00> : vector<2x8x8xf32>
    %50 = tpu.matmul %49, %35, %cst_37 {dimension_numbers = #tpu.dot_dimension_numbers<[2], [1], [1], [2], [0, 0, 0, 1, 1, 2], [0], [0]>} : vector<2x8x8xbf16>, vector<2x8x8xbf16>, vector<2x8x8xf32> -> vector<2x8x8xf32>
    "tpu.trace_stop"() : () -> ()
    %51 = vector.shape_cast %50 : vector<2x8x8xf32> to vector<16x8xf32>
    %52 = arith.truncf %51 : vector<16x8xf32> to vector<16x8xbf16>
    %c0_38 = arith.constant 0 : index
    %c0_39 = arith.constant 0 : index
    %c0_40 = arith.constant 0 : index
    %c0_41 = arith.constant 0 : index
    %53 = vector.load %arg9[%c0_38, %c0_39, %c0_40, %c0_41] : memref<1x4x8x32xbf16, #tpu.memory_space<vmem>>, vector<1x1x8x32xbf16>
    %54 = vector.shape_cast %53 : vector<1x1x8x32xbf16> to vector<8x32xbf16>
    %cst_42 = arith.constant dense<0.000000e+00> : vector<16x32xf32>
    %55 = tpu.matmul %52, %54, %cst_42 {dimension_numbers = #tpu.dot_dimension_numbers<[1], [0], [0], [1], [0, 0, 1, 1], [], []>} : vector<16x8xbf16>, vector<8x32xbf16>, vector<16x32xf32> -> vector<16x32xf32>
    %56 = arith.addf %8, %55 : vector<16x32xf32>
    %c0_43 = arith.constant 0 : index
    %c1 = arith.constant 1 : index
    %c0_44 = arith.constant 0 : index
    %c0_45 = arith.constant 0 : index
    %57 = vector.load %arg3[%c0_43, %c1, %c0_44, %c0_45] : memref<1x4x32x8xbf16, #tpu.memory_space<vmem>>, vector<1x1x32x8xbf16>
    %58 = vector.shape_cast %57 : vector<1x1x32x8xbf16> to vector<32x8xbf16>
    %cst_46 = arith.constant dense<0.000000e+00> : vector<16x8xf32>
    %59 = tpu.matmul %5, %58, %cst_46 {dimension_numbers = #tpu.dot_dimension_numbers<[1], [0], [0], [1], [0, 0, 1, 1], [], []>} : vector<16x32xbf16>, vector<32x8xbf16>, vector<16x8xf32> -> vector<16x8xf32>
    %c0_47 = arith.constant 0 : index
    %c1_48 = arith.constant 1 : index
    %c0_49 = arith.constant 0 : index
    %c0_50 = arith.constant 0 : index
    %60 = vector.load %arg6[%c0_47, %c1_48, %c0_49, %c0_50] : memref<1x4x1x8xf32, #tpu.memory_space<vmem>>, vector<1x1x1x8xf32>
    %61 = vector.shape_cast %60 : vector<1x1x1x8xf32> to vector<1x8xf32>
    %62 = vector.broadcast %61 : vector<1x8xf32> to vector<16x8xf32>
    %63 = arith.addf %59, %62 : vector<16x8xf32>
    %c0_51 = arith.constant 0 : index
    %c1_52 = arith.constant 1 : index
    %c0_53 = arith.constant 0 : index
    %c0_54 = arith.constant 0 : index
    %64 = vector.load %arg4[%c0_51, %c1_52, %c0_53, %c0_54] : memref<1x4x32x8xbf16, #tpu.memory_space<vmem>>, vector<1x1x32x8xbf16>
    %65 = vector.shape_cast %64 : vector<1x1x32x8xbf16> to vector<32x8xbf16>
    %cst_55 = arith.constant dense<0.000000e+00> : vector<16x8xf32>
    %66 = tpu.matmul %5, %65, %cst_55 {dimension_numbers = #tpu.dot_dimension_numbers<[1], [0], [0], [1], [0, 0, 1, 1], [], []>} : vector<16x32xbf16>, vector<32x8xbf16>, vector<16x8xf32> -> vector<16x8xf32>
    %c0_56 = arith.constant 0 : index
    %c1_57 = arith.constant 1 : index
    %c0_58 = arith.constant 0 : index
    %c0_59 = arith.constant 0 : index
    %67 = vector.load %arg7[%c0_56, %c1_57, %c0_58, %c0_59] : memref<1x4x1x8xf32, #tpu.memory_space<vmem>>, vector<1x1x1x8xf32>
    %68 = vector.shape_cast %67 : vector<1x1x1x8xf32> to vector<1x8xf32>
    %69 = vector.broadcast %68 : vector<1x8xf32> to vector<16x8xf32>
    %70 = arith.addf %66, %69 : vector<16x8xf32>
    %c0_60 = arith.constant 0 : index
    %c1_61 = arith.constant 1 : index
    %c0_62 = arith.constant 0 : index
    %c0_63 = arith.constant 0 : index
    %71 = vector.load %arg5[%c0_60, %c1_61, %c0_62, %c0_63] : memref<1x4x32x8xbf16, #tpu.memory_space<vmem>>, vector<1x1x32x8xbf16>
    %72 = vector.shape_cast %71 : vector<1x1x32x8xbf16> to vector<32x8xbf16>
    %cst_64 = arith.constant dense<0.000000e+00> : vector<16x8xf32>
    %73 = tpu.matmul %5, %72, %cst_64 {dimension_numbers = #tpu.dot_dimension_numbers<[1], [0], [0], [1], [0, 0, 1, 1], [], []>} : vector<16x32xbf16>, vector<32x8xbf16>, vector<16x8xf32> -> vector<16x8xf32>
    %c0_65 = arith.constant 0 : index
    %c1_66 = arith.constant 1 : index
    %c0_67 = arith.constant 0 : index
    %c0_68 = arith.constant 0 : index
    %74 = vector.load %arg8[%c0_65, %c1_66, %c0_67, %c0_68] : memref<1x4x1x8xf32, #tpu.memory_space<vmem>>, vector<1x1x1x8xf32>
    %75 = vector.shape_cast %74 : vector<1x1x1x8xf32> to vector<1x8xf32>
    %76 = vector.broadcast %75 : vector<1x8xf32> to vector<16x8xf32>
    %77 = arith.addf %73, %76 : vector<16x8xf32>
    %78 = vector.shape_cast %63 : vector<16x8xf32> to vector<2x8x8xf32>
    %79 = arith.truncf %78 : vector<2x8x8xf32> to vector<2x8x8xbf16>
    %80 = vector.shape_cast %70 : vector<16x8xf32> to vector<2x8x8xf32>
    %81 = arith.truncf %80 : vector<2x8x8xf32> to vector<2x8x8xbf16>
    %82 = vector.shape_cast %77 : vector<16x8xf32> to vector<2x8x8xf32>
    %83 = arith.truncf %82 : vector<2x8x8xf32> to vector<2x8x8xbf16>
    "tpu.trace_start"() <{level = 10 : i32, message = "bqd,bkd->bqk"}> : () -> ()
    %cst_69 = arith.constant dense<0.000000e+00> : vector<2x8x8xf32>
    %84 = tpu.matmul %79, %81, %cst_69 {dimension_numbers = #tpu.dot_dimension_numbers<[2], [2], [1], [1], [0, 0, 0, 1, 1, 1], [0], [0]>} : vector<2x8x8xbf16>, vector<2x8x8xbf16>, vector<2x8x8xf32> -> vector<2x8x8xf32>
    "tpu.trace_stop"() : () -> ()
    %cst_70 = arith.constant 0.353553385 : f32
    %85 = vector.broadcast %cst_70 : f32 to vector<2x8x8xf32>
    %86 = arith.mulf %84, %85 : vector<2x8x8xf32>
    %cst_71 = arith.constant dense<0xFF800000> : vector<2x8xf32>
    %87 = vector.multi_reduction <maximumf>, %86, %cst_71 [2] : vector<2x8x8xf32> to vector<2x8xf32>
    %88 = vector.shape_cast %87 : vector<2x8xf32> to vector<2x8x1xf32>
    %89 = vector.broadcast %88 : vector<2x8x1xf32> to vector<2x8x8xf32>
    %90 = arith.subf %86, %89 : vector<2x8x8xf32>
    %91 = math.exp %90 : vector<2x8x8xf32>
    %cst_72 = arith.constant dense<0.000000e+00> : vector<2x8xf32>
    %92 = vector.multi_reduction <add>, %91, %cst_72 [2] : vector<2x8x8xf32> to vector<2x8xf32>
    %93 = vector.shape_cast %92 : vector<2x8xf32> to vector<2x8x1xf32>
    %94 = tpu.reciprocal %93 {approx = true} : vector<2x8x1xf32> -> vector<2x8x1xf32>
    %95 = vector.broadcast %94 : vector<2x8x1xf32> to vector<2x8x8xf32>
    %96 = arith.mulf %91, %95 : vector<2x8x8xf32>
    %97 = arith.truncf %96 : vector<2x8x8xf32> to vector<2x8x8xbf16>
    "tpu.trace_start"() <{level = 10 : i32, message = "bqk,bkd->bqd"}> : () -> ()
    %cst_73 = arith.constant dense<0.000000e+00> : vector<2x8x8xf32>
    %98 = tpu.matmul %97, %83, %cst_73 {dimension_numbers = #tpu.dot_dimension_numbers<[2], [1], [1], [2], [0, 0, 0, 1, 1, 2], [0], [0]>} : vector<2x8x8xbf16>, vector<2x8x8xbf16>, vector<2x8x8xf32> -> vector<2x8x8xf32>
    "tpu.trace_stop"() : () -> ()
    %99 = vector.shape_cast %98 : vector<2x8x8xf32> to vector<16x8xf32>
    %100 = arith.truncf %99 : vector<16x8xf32> to vector<16x8xbf16>
    %c0_74 = arith.constant 0 : index
    %c1_75 = arith.constant 1 : index
    %c0_76 = arith.constant 0 : index
    %c0_77 = arith.constant 0 : index
    %101 = vector.load %arg9[%c0_74, %c1_75, %c0_76, %c0_77] : memref<1x4x8x32xbf16, #tpu.memory_space<vmem>>, vector<1x1x8x32xbf16>
    %102 = vector.shape_cast %101 : vector<1x1x8x32xbf16> to vector<8x32xbf16>
    %cst_78 = arith.constant dense<0.000000e+00> : vector<16x32xf32>
    %103 = tpu.matmul %100, %102, %cst_78 {dimension_numbers = #tpu.dot_dimension_numbers<[1], [0], [0], [1], [0, 0, 1, 1], [], []>} : vector<16x8xbf16>, vector<8x32xbf16>, vector<16x32xf32> -> vector<16x32xf32>
    %104 = arith.addf %56, %103 : vector<16x32xf32>
    %c0_79 = arith.constant 0 : index
    %c2 = arith.constant 2 : index
    %c0_80 = arith.constant 0 : index
    %c0_81 = arith.constant 0 : index
    %105 = vector.load %arg3[%c0_79, %c2, %c0_80, %c0_81] : memref<1x4x32x8xbf16, #tpu.memory_space<vmem>>, vector<1x1x32x8xbf16>
    %106 = vector.shape_cast %105 : vector<1x1x32x8xbf16> to vector<32x8xbf16>
    %cst_82 = arith.constant dense<0.000000e+00> : vector<16x8xf32>
    %107 = tpu.matmul %5, %106, %cst_82 {dimension_numbers = #tpu.dot_dimension_numbers<[1], [0], [0], [1], [0, 0, 1, 1], [], []>} : vector<16x32xbf16>, vector<32x8xbf16>, vector<16x8xf32> -> vector<16x8xf32>
    %c0_83 = arith.constant 0 : index
    %c2_84 = arith.constant 2 : index
    %c0_85 = arith.constant 0 : index
    %c0_86 = arith.constant 0 : index
    %108 = vector.load %arg6[%c0_83, %c2_84, %c0_85, %c0_86] : memref<1x4x1x8xf32, #tpu.memory_space<vmem>>, vector<1x1x1x8xf32>
    %109 = vector.shape_cast %108 : vector<1x1x1x8xf32> to vector<1x8xf32>
    %110 = vector.broadcast %109 : vector<1x8xf32> to vector<16x8xf32>
    %111 = arith.addf %107, %110 : vector<16x8xf32>
    %c0_87 = arith.constant 0 : index
    %c2_88 = arith.constant 2 : index
    %c0_89 = arith.constant 0 : index
    %c0_90 = arith.constant 0 : index
    %112 = vector.load %arg4[%c0_87, %c2_88, %c0_89, %c0_90] : memref<1x4x32x8xbf16, #tpu.memory_space<vmem>>, vector<1x1x32x8xbf16>
    %113 = vector.shape_cast %112 : vector<1x1x32x8xbf16> to vector<32x8xbf16>
    %cst_91 = arith.constant dense<0.000000e+00> : vector<16x8xf32>
    %114 = tpu.matmul %5, %113, %cst_91 {dimension_numbers = #tpu.dot_dimension_numbers<[1], [0], [0], [1], [0, 0, 1, 1], [], []>} : vector<16x32xbf16>, vector<32x8xbf16>, vector<16x8xf32> -> vector<16x8xf32>
    %c0_92 = arith.constant 0 : index
    %c2_93 = arith.constant 2 : index
    %c0_94 = arith.constant 0 : index
    %c0_95 = arith.constant 0 : index
    %115 = vector.load %arg7[%c0_92, %c2_93, %c0_94, %c0_95] : memref<1x4x1x8xf32, #tpu.memory_space<vmem>>, vector<1x1x1x8xf32>
    %116 = vector.shape_cast %115 : vector<1x1x1x8xf32> to vector<1x8xf32>
    %117 = vector.broadcast %116 : vector<1x8xf32> to vector<16x8xf32>
    %118 = arith.addf %114, %117 : vector<16x8xf32>
    %c0_96 = arith.constant 0 : index
    %c2_97 = arith.constant 2 : index
    %c0_98 = arith.constant 0 : index
    %c0_99 = arith.constant 0 : index
    %119 = vector.load %arg5[%c0_96, %c2_97, %c0_98, %c0_99] : memref<1x4x32x8xbf16, #tpu.memory_space<vmem>>, vector<1x1x32x8xbf16>
    %120 = vector.shape_cast %119 : vector<1x1x32x8xbf16> to vector<32x8xbf16>
    %cst_100 = arith.constant dense<0.000000e+00> : vector<16x8xf32>
    %121 = tpu.matmul %5, %120, %cst_100 {dimension_numbers = #tpu.dot_dimension_numbers<[1], [0], [0], [1], [0, 0, 1, 1], [], []>} : vector<16x32xbf16>, vector<32x8xbf16>, vector<16x8xf32> -> vector<16x8xf32>
    %c0_101 = arith.constant 0 : index
    %c2_102 = arith.constant 2 : index
    %c0_103 = arith.constant 0 : index
    %c0_104 = arith.constant 0 : index
    %122 = vector.load %arg8[%c0_101, %c2_102, %c0_103, %c0_104] : memref<1x4x1x8xf32, #tpu.memory_space<vmem>>, vector<1x1x1x8xf32>
    %123 = vector.shape_cast %122 : vector<1x1x1x8xf32> to vector<1x8xf32>
    %124 = vector.broadcast %123 : vector<1x8xf32> to vector<16x8xf32>
    %125 = arith.addf %121, %124 : vector<16x8xf32>
    %126 = vector.shape_cast %111 : vector<16x8xf32> to vector<2x8x8xf32>
    %127 = arith.truncf %126 : vector<2x8x8xf32> to vector<2x8x8xbf16>
    %128 = vector.shape_cast %118 : vector<16x8xf32> to vector<2x8x8xf32>
    %129 = arith.truncf %128 : vector<2x8x8xf32> to vector<2x8x8xbf16>
    %130 = vector.shape_cast %125 : vector<16x8xf32> to vector<2x8x8xf32>
    %131 = arith.truncf %130 : vector<2x8x8xf32> to vector<2x8x8xbf16>
    "tpu.trace_start"() <{level = 10 : i32, message = "bqd,bkd->bqk"}> : () -> ()
    %cst_105 = arith.constant dense<0.000000e+00> : vector<2x8x8xf32>
    %132 = tpu.matmul %127, %129, %cst_105 {dimension_numbers = #tpu.dot_dimension_numbers<[2], [2], [1], [1], [0, 0, 0, 1, 1, 1], [0], [0]>} : vector<2x8x8xbf16>, vector<2x8x8xbf16>, vector<2x8x8xf32> -> vector<2x8x8xf32>
    "tpu.trace_stop"() : () -> ()
    %cst_106 = arith.constant 0.353553385 : f32
    %133 = vector.broadcast %cst_106 : f32 to vector<2x8x8xf32>
    %134 = arith.mulf %132, %133 : vector<2x8x8xf32>
    %cst_107 = arith.constant dense<0xFF800000> : vector<2x8xf32>
    %135 = vector.multi_reduction <maximumf>, %134, %cst_107 [2] : vector<2x8x8xf32> to vector<2x8xf32>
    %136 = vector.shape_cast %135 : vector<2x8xf32> to vector<2x8x1xf32>
    %137 = vector.broadcast %136 : vector<2x8x1xf32> to vector<2x8x8xf32>
    %138 = arith.subf %134, %137 : vector<2x8x8xf32>
    %139 = math.exp %138 : vector<2x8x8xf32>
    %cst_108 = arith.constant dense<0.000000e+00> : vector<2x8xf32>
    %140 = vector.multi_reduction <add>, %139, %cst_108 [2] : vector<2x8x8xf32> to vector<2x8xf32>
    %141 = vector.shape_cast %140 : vector<2x8xf32> to vector<2x8x1xf32>
    %142 = tpu.reciprocal %141 {approx = true} : vector<2x8x1xf32> -> vector<2x8x1xf32>
    %143 = vector.broadcast %142 : vector<2x8x1xf32> to vector<2x8x8xf32>
    %144 = arith.mulf %139, %143 : vector<2x8x8xf32>
    %145 = arith.truncf %144 : vector<2x8x8xf32> to vector<2x8x8xbf16>
    "tpu.trace_start"() <{level = 10 : i32, message = "bqk,bkd->bqd"}> : () -> ()
    %cst_109 = arith.constant dense<0.000000e+00> : vector<2x8x8xf32>
    %146 = tpu.matmul %145, %131, %cst_109 {dimension_numbers = #tpu.dot_dimension_numbers<[2], [1], [1], [2], [0, 0, 0, 1, 1, 2], [0], [0]>} : vector<2x8x8xbf16>, vector<2x8x8xbf16>, vector<2x8x8xf32> -> vector<2x8x8xf32>
    "tpu.trace_stop"() : () -> ()
    %147 = vector.shape_cast %146 : vector<2x8x8xf32> to vector<16x8xf32>
    %148 = arith.truncf %147 : vector<16x8xf32> to vector<16x8xbf16>
    %c0_110 = arith.constant 0 : index
    %c2_111 = arith.constant 2 : index
    %c0_112 = arith.constant 0 : index
    %c0_113 = arith.constant 0 : index
    %149 = vector.load %arg9[%c0_110, %c2_111, %c0_112, %c0_113] : memref<1x4x8x32xbf16, #tpu.memory_space<vmem>>, vector<1x1x8x32xbf16>
    %150 = vector.shape_cast %149 : vector<1x1x8x32xbf16> to vector<8x32xbf16>
    %cst_114 = arith.constant dense<0.000000e+00> : vector<16x32xf32>
    %151 = tpu.matmul %148, %150, %cst_114 {dimension_numbers = #tpu.dot_dimension_numbers<[1], [0], [0], [1], [0, 0, 1, 1], [], []>} : vector<16x8xbf16>, vector<8x32xbf16>, vector<16x32xf32> -> vector<16x32xf32>
    %152 = arith.addf %104, %151 : vector<16x32xf32>
    %c0_115 = arith.constant 0 : index
    %c3 = arith.constant 3 : index
    %c0_116 = arith.constant 0 : index
    %c0_117 = arith.constant 0 : index
    %153 = vector.load %arg3[%c0_115, %c3, %c0_116, %c0_117] : memref<1x4x32x8xbf16, #tpu.memory_space<vmem>>, vector<1x1x32x8xbf16>
    %154 = vector.shape_cast %153 : vector<1x1x32x8xbf16> to vector<32x8xbf16>
    %cst_118 = arith.constant dense<0.000000e+00> : vector<16x8xf32>
    %155 = tpu.matmul %5, %154, %cst_118 {dimension_numbers = #tpu.dot_dimension_numbers<[1], [0], [0], [1], [0, 0, 1, 1], [], []>} : vector<16x32xbf16>, vector<32x8xbf16>, vector<16x8xf32> -> vector<16x8xf32>
    %c0_119 = arith.constant 0 : index
    %c3_120 = arith.constant 3 : index
    %c0_121 = arith.constant 0 : index
    %c0_122 = arith.constant 0 : index
    %156 = vector.load %arg6[%c0_119, %c3_120, %c0_121, %c0_122] : memref<1x4x1x8xf32, #tpu.memory_space<vmem>>, vector<1x1x1x8xf32>
    %157 = vector.shape_cast %156 : vector<1x1x1x8xf32> to vector<1x8xf32>
    %158 = vector.broadcast %157 : vector<1x8xf32> to vector<16x8xf32>
    %159 = arith.addf %155, %158 : vector<16x8xf32>
    %c0_123 = arith.constant 0 : index
    %c3_124 = arith.constant 3 : index
    %c0_125 = arith.constant 0 : index
    %c0_126 = arith.constant 0 : index
    %160 = vector.load %arg4[%c0_123, %c3_124, %c0_125, %c0_126] : memref<1x4x32x8xbf16, #tpu.memory_space<vmem>>, vector<1x1x32x8xbf16>
    %161 = vector.shape_cast %160 : vector<1x1x32x8xbf16> to vector<32x8xbf16>
    %cst_127 = arith.constant dense<0.000000e+00> : vector<16x8xf32>
    %162 = tpu.matmul %5, %161, %cst_127 {dimension_numbers = #tpu.dot_dimension_numbers<[1], [0], [0], [1], [0, 0, 1, 1], [], []>} : vector<16x32xbf16>, vector<32x8xbf16>, vector<16x8xf32> -> vector<16x8xf32>
    %c0_128 = arith.constant 0 : index
    %c3_129 = arith.constant 3 : index
    %c0_130 = arith.constant 0 : index
    %c0_131 = arith.constant 0 : index
    %163 = vector.load %arg7[%c0_128, %c3_129, %c0_130, %c0_131] : memref<1x4x1x8xf32, #tpu.memory_space<vmem>>, vector<1x1x1x8xf32>
    %164 = vector.shape_cast %163 : vector<1x1x1x8xf32> to vector<1x8xf32>
    %165 = vector.broadcast %164 : vector<1x8xf32> to vector<16x8xf32>
    %166 = arith.addf %162, %165 : vector<16x8xf32>
    %c0_132 = arith.constant 0 : index
    %c3_133 = arith.constant 3 : index
    %c0_134 = arith.constant 0 : index
    %c0_135 = arith.constant 0 : index
    %167 = vector.load %arg5[%c0_132, %c3_133, %c0_134, %c0_135] : memref<1x4x32x8xbf16, #tpu.memory_space<vmem>>, vector<1x1x32x8xbf16>
    %168 = vector.shape_cast %167 : vector<1x1x32x8xbf16> to vector<32x8xbf16>
    %cst_136 = arith.constant dense<0.000000e+00> : vector<16x8xf32>
    %169 = tpu.matmul %5, %168, %cst_136 {dimension_numbers = #tpu.dot_dimension_numbers<[1], [0], [0], [1], [0, 0, 1, 1], [], []>} : vector<16x32xbf16>, vector<32x8xbf16>, vector<16x8xf32> -> vector<16x8xf32>
    %c0_137 = arith.constant 0 : index
    %c3_138 = arith.constant 3 : index
    %c0_139 = arith.constant 0 : index
    %c0_140 = arith.constant 0 : index
    %170 = vector.load %arg8[%c0_137, %c3_138, %c0_139, %c0_140] : memref<1x4x1x8xf32, #tpu.memory_space<vmem>>, vector<1x1x1x8xf32>
    %171 = vector.shape_cast %170 : vector<1x1x1x8xf32> to vector<1x8xf32>
    %172 = vector.broadcast %171 : vector<1x8xf32> to vector<16x8xf32>
    %173 = arith.addf %169, %172 : vector<16x8xf32>
    %174 = vector.shape_cast %159 : vector<16x8xf32> to vector<2x8x8xf32>
    %175 = arith.truncf %174 : vector<2x8x8xf32> to vector<2x8x8xbf16>
    %176 = vector.shape_cast %166 : vector<16x8xf32> to vector<2x8x8xf32>
    %177 = arith.truncf %176 : vector<2x8x8xf32> to vector<2x8x8xbf16>
    %178 = vector.shape_cast %173 : vector<16x8xf32> to vector<2x8x8xf32>
    %179 = arith.truncf %178 : vector<2x8x8xf32> to vector<2x8x8xbf16>
    "tpu.trace_start"() <{level = 10 : i32, message = "bqd,bkd->bqk"}> : () -> ()
    %cst_141 = arith.constant dense<0.000000e+00> : vector<2x8x8xf32>
    %180 = tpu.matmul %175, %177, %cst_141 {dimension_numbers = #tpu.dot_dimension_numbers<[2], [2], [1], [1], [0, 0, 0, 1, 1, 1], [0], [0]>} : vector<2x8x8xbf16>, vector<2x8x8xbf16>, vector<2x8x8xf32> -> vector<2x8x8xf32>
    "tpu.trace_stop"() : () -> ()
    %cst_142 = arith.constant 0.353553385 : f32
    %181 = vector.broadcast %cst_142 : f32 to vector<2x8x8xf32>
    %182 = arith.mulf %180, %181 : vector<2x8x8xf32>
    %cst_143 = arith.constant dense<0xFF800000> : vector<2x8xf32>
    %183 = vector.multi_reduction <maximumf>, %182, %cst_143 [2] : vector<2x8x8xf32> to vector<2x8xf32>
    %184 = vector.shape_cast %183 : vector<2x8xf32> to vector<2x8x1xf32>
    %185 = vector.broadcast %184 : vector<2x8x1xf32> to vector<2x8x8xf32>
    %186 = arith.subf %182, %185 : vector<2x8x8xf32>
    %187 = math.exp %186 : vector<2x8x8xf32>
    %cst_144 = arith.constant dense<0.000000e+00> : vector<2x8xf32>
    %188 = vector.multi_reduction <add>, %187, %cst_144 [2] : vector<2x8x8xf32> to vector<2x8xf32>
    %189 = vector.shape_cast %188 : vector<2x8xf32> to vector<2x8x1xf32>
    %190 = tpu.reciprocal %189 {approx = true} : vector<2x8x1xf32> -> vector<2x8x1xf32>
    %191 = vector.broadcast %190 : vector<2x8x1xf32> to vector<2x8x8xf32>
    %192 = arith.mulf %187, %191 : vector<2x8x8xf32>
    %193 = arith.truncf %192 : vector<2x8x8xf32> to vector<2x8x8xbf16>
    "tpu.trace_start"() <{level = 10 : i32, message = "bqk,bkd->bqd"}> : () -> ()
    %cst_145 = arith.constant dense<0.000000e+00> : vector<2x8x8xf32>
    %194 = tpu.matmul %193, %179, %cst_145 {dimension_numbers = #tpu.dot_dimension_numbers<[2], [1], [1], [2], [0, 0, 0, 1, 1, 2], [0], [0]>} : vector<2x8x8xbf16>, vector<2x8x8xbf16>, vector<2x8x8xf32> -> vector<2x8x8xf32>
    "tpu.trace_stop"() : () -> ()
    %195 = vector.shape_cast %194 : vector<2x8x8xf32> to vector<16x8xf32>
    %196 = arith.truncf %195 : vector<16x8xf32> to vector<16x8xbf16>
    %c0_146 = arith.constant 0 : index
    %c3_147 = arith.constant 3 : index
    %c0_148 = arith.constant 0 : index
    %c0_149 = arith.constant 0 : index
    %197 = vector.load %arg9[%c0_146, %c3_147, %c0_148, %c0_149] : memref<1x4x8x32xbf16, #tpu.memory_space<vmem>>, vector<1x1x8x32xbf16>
    %198 = vector.shape_cast %197 : vector<1x1x8x32xbf16> to vector<8x32xbf16>
    %cst_150 = arith.constant dense<0.000000e+00> : vector<16x32xf32>
    %199 = tpu.matmul %196, %198, %cst_150 {dimension_numbers = #tpu.dot_dimension_numbers<[1], [0], [0], [1], [0, 0, 1, 1], [], []>} : vector<16x8xbf16>, vector<8x32xbf16>, vector<16x32xf32> -> vector<16x32xf32>
    %200 = arith.addf %152, %199 : vector<16x32xf32>
    %201 = vector.broadcast %7 : vector<1x32xf32> to vector<16x32xf32>
    %202 = arith.addf %200, %201 : vector<16x32xf32>
    %203 = arith.addf %4, %202 : vector<16x32xf32>
    %c0_151 = arith.constant 0 : index
    %c0_152 = arith.constant 0 : index
    %c0_153 = arith.constant 0 : index
    %204 = vector.load %arg11[%c0_151, %c0_152, %c0_153] : memref<1x1x32xf32, #tpu.memory_space<vmem>>, vector<1x1x32xf32>
    %205 = vector.shape_cast %204 : vector<1x1x32xf32> to vector<1x32xf32>
    %c0_154 = arith.constant 0 : index
    %c0_155 = arith.constant 0 : index
    %c0_156 = arith.constant 0 : index
    %206 = vector.load %arg12[%c0_154, %c0_155, %c0_156] : memref<1x1x32xf32, #tpu.memory_space<vmem>>, vector<1x1x32xf32>
    %207 = vector.shape_cast %206 : vector<1x1x32xf32> to vector<1x32xf32>
    %cst_157 = arith.constant dense<0.000000e+00> : vector<16xf32>
    %208 = vector.multi_reduction <add>, %203, %cst_157 [1] : vector<16x32xf32> to vector<16xf32>
    %209 = vector.shape_cast %208 : vector<16xf32> to vector<16x1xf32>
    %cst_158 = arith.constant 3.200000e+01 : f32
    %210 = vector.broadcast %cst_158 : f32 to vector<16x1xf32>
    %211 = arith.divf %209, %210 : vector<16x1xf32>
    %212 = vector.broadcast %211 : vector<16x1xf32> to vector<16x32xf32>
    %213 = arith.subf %203, %212 : vector<16x32xf32>
    %214 = arith.mulf %213, %213 : vector<16x32xf32>
    %cst_159 = arith.constant dense<0.000000e+00> : vector<16xf32>
    %215 = vector.multi_reduction <add>, %214, %cst_159 [1] : vector<16x32xf32> to vector<16xf32>
    %216 = vector.shape_cast %215 : vector<16xf32> to vector<16x1xf32>
    %cst_160 = arith.constant 3.200000e+01 : f32
    %217 = vector.broadcast %cst_160 : f32 to vector<16x1xf32>
    %218 = arith.divf %216, %217 : vector<16x1xf32>
    %219 = vector.broadcast %211 : vector<16x1xf32> to vector<16x32xf32>
    %220 = arith.subf %203, %219 : vector<16x32xf32>
    %cst_161 = arith.constant 9.99999974E-6 : f32
    %221 = vector.broadcast %cst_161 : f32 to vector<16x1xf32>
    %222 = arith.addf %218, %221 : vector<16x1xf32>
    %223 = math.rsqrt %222 : vector<16x1xf32>
    %224 = vector.broadcast %223 : vector<16x1xf32> to vector<16x32xf32>
    %225 = arith.mulf %220, %224 : vector<16x32xf32>
    %226 = vector.broadcast %205 : vector<1x32xf32> to vector<16x32xf32>
    %227 = arith.mulf %225, %226 : vector<16x32xf32>
    %228 = vector.broadcast %207 : vector<1x32xf32> to vector<16x32xf32>
    %229 = arith.addf %227, %228 : vector<16x32xf32>
    %230 = arith.truncf %229 : vector<16x32xf32> to vector<16x32xbf16>
    %c0_162 = arith.constant 0 : index
    %c0_163 = arith.constant 0 : index
    %c0_164 = arith.constant 0 : index
    %231 = vector.load %arg13[%c0_162, %c0_163, %c0_164] : memref<1x32x64xbf16, #tpu.memory_space<vmem>>, vector<1x32x64xbf16>
    %232 = vector.shape_cast %231 : vector<1x32x64xbf16> to vector<32x64xbf16>
    %cst_165 = arith.constant dense<0.000000e+00> : vector<16x64xf32>
    %233 = tpu.matmul %230, %232, %cst_165 {dimension_numbers = #tpu.dot_dimension_numbers<[1], [0], [0], [1], [0, 0, 1, 1], [], []>} : vector<16x32xbf16>, vector<32x64xbf16>, vector<16x64xf32> -> vector<16x64xf32>
    %c0_166 = arith.constant 0 : index
    %c0_167 = arith.constant 0 : index
    %c0_168 = arith.constant 0 : index
    %234 = vector.load %arg14[%c0_166, %c0_167, %c0_168] : memref<1x1x64xf32, #tpu.memory_space<vmem>>, vector<1x1x64xf32>
    %235 = vector.shape_cast %234 : vector<1x1x64xf32> to vector<1x64xf32>
    %236 = vector.broadcast %235 : vector<1x64xf32> to vector<16x64xf32>
    %237 = arith.addf %233, %236 : vector<16x64xf32>
    %cst_169 = arith.constant 0.000000e+00 : f32
    %238 = vector.broadcast %cst_169 : f32 to vector<16x64xf32>
    %239 = arith.maximumf %237, %238 : vector<16x64xf32>
    %240 = arith.truncf %239 : vector<16x64xf32> to vector<16x64xbf16>
    %c0_170 = arith.constant 0 : index
    %c0_171 = arith.constant 0 : index
    %c0_172 = arith.constant 0 : index
    %241 = vector.load %arg15[%c0_170, %c0_171, %c0_172] : memref<1x64x32xbf16, #tpu.memory_space<vmem>>, vector<1x64x32xbf16>
    %242 = vector.shape_cast %241 : vector<1x64x32xbf16> to vector<64x32xbf16>
    %cst_173 = arith.constant dense<0.000000e+00> : vector<16x32xf32>
    %243 = tpu.matmul %240, %242, %cst_173 {dimension_numbers = #tpu.dot_dimension_numbers<[1], [0], [0], [1], [0, 0, 1, 1], [], []>} : vector<16x64xbf16>, vector<64x32xbf16>, vector<16x32xf32> -> vector<16x32xf32>
    %c0_174 = arith.constant 0 : index
    %c0_175 = arith.constant 0 : index
    %c0_176 = arith.constant 0 : index
    %244 = vector.load %arg16[%c0_174, %c0_175, %c0_176] : memref<1x1x32xf32, #tpu.memory_space<vmem>>, vector<1x1x32xf32>
    %245 = vector.shape_cast %244 : vector<1x1x32xf32> to vector<1x32xf32>
    %246 = vector.broadcast %245 : vector<1x32xf32> to vector<16x32xf32>
    %247 = arith.addf %243, %246 : vector<16x32xf32>
    %248 = arith.addf %229, %247 : vector<16x32xf32>
    %c0_177 = arith.constant 0 : index
    %c0_178 = arith.constant 0 : index
    %c0_179 = arith.constant 0 : index
    %249 = vector.load %arg17[%c0_177, %c0_178, %c0_179] : memref<1x1x32xf32, #tpu.memory_space<vmem>>, vector<1x1x32xf32>
    %250 = vector.shape_cast %249 : vector<1x1x32xf32> to vector<1x32xf32>
    %c0_180 = arith.constant 0 : index
    %c0_181 = arith.constant 0 : index
    %c0_182 = arith.constant 0 : index
    %251 = vector.load %arg18[%c0_180, %c0_181, %c0_182] : memref<1x1x32xf32, #tpu.memory_space<vmem>>, vector<1x1x32xf32>
    %252 = vector.shape_cast %251 : vector<1x1x32xf32> to vector<1x32xf32>
    %cst_183 = arith.constant dense<0.000000e+00> : vector<16xf32>
    %253 = vector.multi_reduction <add>, %248, %cst_183 [1] : vector<16x32xf32> to vector<16xf32>
    %254 = vector.shape_cast %253 : vector<16xf32> to vector<16x1xf32>
    %cst_184 = arith.constant 3.200000e+01 : f32
    %255 = vector.broadcast %cst_184 : f32 to vector<16x1xf32>
    %256 = arith.divf %254, %255 : vector<16x1xf32>
    %257 = vector.broadcast %256 : vector<16x1xf32> to vector<16x32xf32>
    %258 = arith.subf %248, %257 : vector<16x32xf32>
    %259 = arith.mulf %258, %258 : vector<16x32xf32>
    %cst_185 = arith.constant dense<0.000000e+00> : vector<16xf32>
    %260 = vector.multi_reduction <add>, %259, %cst_185 [1] : vector<16x32xf32> to vector<16xf32>
    %261 = vector.shape_cast %260 : vector<16xf32> to vector<16x1xf32>
    %cst_186 = arith.constant 3.200000e+01 : f32
    %262 = vector.broadcast %cst_186 : f32 to vector<16x1xf32>
    %263 = arith.divf %261, %262 : vector<16x1xf32>
    %264 = vector.broadcast %256 : vector<16x1xf32> to vector<16x32xf32>
    %265 = arith.subf %248, %264 : vector<16x32xf32>
    %cst_187 = arith.constant 9.99999974E-6 : f32
    %266 = vector.broadcast %cst_187 : f32 to vector<16x1xf32>
    %267 = arith.addf %263, %266 : vector<16x1xf32>
    %268 = math.rsqrt %267 : vector<16x1xf32>
    %269 = vector.broadcast %268 : vector<16x1xf32> to vector<16x32xf32>
    %270 = arith.mulf %265, %269 : vector<16x32xf32>
    %271 = vector.broadcast %250 : vector<1x32xf32> to vector<16x32xf32>
    %272 = arith.mulf %270, %271 : vector<16x32xf32>
    %273 = vector.broadcast %252 : vector<1x32xf32> to vector<16x32xf32>
    %274 = arith.addf %272, %273 : vector<16x32xf32>
    %275 = vector.shape_cast %274 : vector<16x32xf32> to vector<2x8x32xf32>
    %c0_188 = arith.constant 0 : index
    %c0_189 = arith.constant 0 : index
    %c0_190 = arith.constant 0 : index
    %276 = vector.load %arg19[%c0_188, %c0_189, %c0_190] : memref<2x8x32xf32, #tpu.memory_space<vmem>>, vector<2x8x32xf32>
    tpu.vector_store %arg19[%c0_188, %c0_189, %c0_190], %275 {strides = array<i32>} : memref<2x8x32xf32, #tpu.memory_space<vmem>>, vector<2x8x32xf32>,
    return
  }
  func.func @transform_0(%arg0: i32, %arg1: i32) -> (i32, i32, i32) {
    %c0_i32 = arith.constant 0 : i32
    %c0_i32_0 = arith.constant 0 : i32
    %c0_i32_1 = arith.constant 0 : i32
    return %arg0, %c0_i32, %c0_i32_0 : i32, i32, i32
  }
  func.func @transform_1(%arg0: i32, %arg1: i32) -> (i32, i32, i32, i32) {
    %c0_i32 = arith.constant 0 : i32
    %c0_i32_0 = arith.constant 0 : i32
    %c0_i32_1 = arith.constant 0 : i32
    %c0_i32_2 = arith.constant 0 : i32
    return %arg1, %c0_i32, %c0_i32_0, %c0_i32_1 : i32, i32, i32, i32
  }
  func.func @transform_2(%arg0: i32, %arg1: i32) -> (i32, i32, i32, i32) {
    %c0_i32 = arith.constant 0 : i32
    %c0_i32_0 = arith.constant 0 : i32
    %c0_i32_1 = arith.constant 0 : i32
    %c0_i32_2 = arith.constant 0 : i32
    return %arg1, %c0_i32, %c0_i32_0, %c0_i32_1 : i32, i32, i32, i32
  }
  func.func @transform_3(%arg0: i32, %arg1: i32) -> (i32, i32, i32, i32) {
    %c0_i32 = arith.constant 0 : i32
    %c0_i32_0 = arith.constant 0 : i32
    %c0_i32_1 = arith.constant 0 : i32
    %c0_i32_2 = arith.constant 0 : i32
    return %arg1, %c0_i32, %c0_i32_0, %c0_i32_1 : i32, i32, i32, i32
  }
  func.func @transform_4(%arg0: i32, %arg1: i32) -> (i32, i32, i32, i32) {
    %c0_i32 = arith.constant 0 : i32
    %c0_i32_0 = arith.constant 0 : i32
    %c0_i32_1 = arith.constant 0 : i32
    %c0_i32_2 = arith.constant 0 : i32
    return %arg1, %c0_i32, %c0_i32_0, %c0_i32_1 : i32, i32, i32, i32
  }
  func.func @transform_5(%arg0: i32, %arg1: i32) -> (i32, i32, i32, i32) {
    %c0_i32 = arith.constant 0 : i32
    %c0_i32_0 = arith.constant 0 : i32
    %c0_i32_1 = arith.constant 0 : i32
    %c0_i32_2 = arith.constant 0 : i32
    return %arg1, %c0_i32, %c0_i32_0, %c0_i32_1 : i32, i32, i32, i32
  }
  func.func @transform_6(%arg0: i32, %arg1: i32) -> (i32, i32, i32, i32) {
    %c0_i32 = arith.constant 0 : i32
    %c0_i32_0 = arith.constant 0 : i32
    %c0_i32_1 = arith.constant 0 : i32
    %c0_i32_2 = arith.constant 0 : i32
    return %arg1, %c0_i32, %c0_i32_0, %c0_i32_1 : i32, i32, i32, i32
  }
  func.func @transform_7(%arg0: i32, %arg1: i32) -> (i32, i32, i32, i32) {
    %c0_i32 = arith.constant 0 : i32
    %c0_i32_0 = arith.constant 0 : i32
    %c0_i32_1 = arith.constant 0 : i32
    %c0_i32_2 = arith.constant 0 : i32
    return %arg1, %c0_i32, %c0_i32_0, %c0_i32_1 : i32, i32, i32, i32
  }
  func.func @transform_8(%arg0: i32, %arg1: i32) -> (i32, i32, i32) {
    %c0_i32 = arith.constant 0 : i32
    %c0_i32_0 = arith.constant 0 : i32
    %c0_i32_1 = arith.constant 0 : i32
    return %arg1, %c0_i32, %c0_i32_0 : i32, i32, i32
  }
  func.func @transform_9(%arg0: i32, %arg1: i32) -> (i32, i32, i32) {
    %c0_i32 = arith.constant 0 : i32
    %c0_i32_0 = arith.constant 0 : i32
    %c0_i32_1 = arith.constant 0 : i32
    return %arg1, %c0_i32, %c0_i32_0 : i32, i32, i32
  }
  func.func @transform_10(%arg0: i32, %arg1: i32) -> (i32, i32, i32) {
    %c0_i32 = arith.constant 0 : i32
    %c0_i32_0 = arith.constant 0 : i32
    %c0_i32_1 = arith.constant 0 : i32
    return %arg1, %c0_i32, %c0_i32_0 : i32, i32, i32
  }
  func.func @transform_11(%arg0: i32, %arg1: i32) -> (i32, i32, i32) {
    %c0_i32 = arith.constant 0 : i32
    %c0_i32_0 = arith.constant 0 : i32
    %c0_i32_1 = arith.constant 0 : i32
    return %arg1, %c0_i32, %c0_i32_0 : i32, i32, i32
  }
  func.func @transform_12(%arg0: i32, %arg1: i32) -> (i32, i32, i32) {
    %c0_i32 = arith.constant 0 : i32
    %c0_i32_0 = arith.constant 0 : i32
    %c0_i32_1 = arith.constant 0 : i32
    return %arg1, %c0_i32, %c0_i32_0 : i32, i32, i32
  }
  func.func @transform_13(%arg0: i32, %arg1: i32) -> (i32, i32, i32) {
    %c0_i32 = arith.constant 0 : i32
    %c0_i32_0 = arith.constant 0 : i32
    %c0_i32_1 = arith.constant 0 : i32
    return %arg1, %c0_i32, %c0_i32_0 : i32, i32, i32
  }
  func.func @transform_14(%arg0: i32, %arg1: i32) -> (i32, i32, i32) {
    %c0_i32 = arith.constant 0 : i32
    %c0_i32_0 = arith.constant 0 : i32
    %c0_i32_1 = arith.constant 0 : i32
    return %arg1, %c0_i32, %c0_i32_0 : i32, i32, i32
  }
  func.func @transform_15(%arg0: i32, %arg1: i32) -> (i32, i32, i32) {
    %c0_i32 = arith.constant 0 : i32
    %c0_i32_0 = arith.constant 0 : i32
    %c0_i32_1 = arith.constant 0 : i32
    return %arg1, %c0_i32, %c0_i32_0 : i32, i32, i32
  }
  func.func @transform_16(%arg0: i32, %arg1: i32) -> (i32, i32, i32) {
    %c0_i32 = arith.constant 0 : i32
    %c0_i32_0 = arith.constant 0 : i32
    %c0_i32_1 = arith.constant 0 : i32
    return %arg1, %c0_i32, %c0_i32_0 : i32, i32, i32
  }
  func.func @transform_17(%arg0: i32, %arg1: i32) -> (i32, i32, i32) {
    %c0_i32 = arith.constant 0 : i32
    %c0_i32_0 = arith.constant 0 : i32
    %c0_i32_1 = arith.constant 0 : i32
    return %arg0, %c0_i32, %c0_i32_0 : i32, i32, i32
  }
}

</mosaic_0001>

<bundles_post_ra>
// kernel: tpu_custom_call.1
= control target key start
LH: loop header
LB: loop body
LE: loop exit
PB: predicated region body
PF: predicated region fallthrough
CT: control target
= control target key end

     0   :  { %s4388_s0 = inlined_call_operand.vmem [shape: f32[2,8,32], index: 0, kind: input, shape index: {}]   ;;  %s4389_s1 = inlined_call_operand.vmem [shape: bf16[2,4,32,8], index: 1, kind: input, shape index: {}]   ;;  %s4390_s2 = inlined_call_operand.vmem [shape: bf16[2,4,32,8], index: 2, kind: input, shape index: {}]   ;;  %s4391_s3 = inlined_call_operand.vmem [shape: bf16[2,4,32,8], index: 3, kind: input, shape index: {}]   ;;  %s4392_s4 = inlined_call_operand.vmem [shape: f32[2,4,1,8], index: 4, kind: input, shape index: {}]   ;;  %s4393_s5 = inlined_call_operand.vmem [shape: f32[2,4,1,8], index: 5, kind: input, shape index: {}]   ;;  %s4394_s6 = inlined_call_operand.vmem [shape: f32[2,4,1,8], index: 6, kind: input, shape index: {}]   ;;  %s4395_s7 = inlined_call_operand.vmem [shape: bf16[2,4,8,32], index: 7, kind: input, shape index: {}]   ;;  %s4396_s8 = inlined_call_operand.vmem [shape: f32[2,1,32], index: 8, kind: input, shape index: {}]   ;;  %s4397_s9 = inlined_call_operand.vmem [shape: f32[2,1,32], index: 9, kind: input, shape index: {}]   ;;  %s4398_s10 = inlined_call_operand.vmem [shape: f32[2,1,32], index: 10, kind: input, shape index: {}]   ;;  %s4399_s11 = inlined_call_operand.vmem [shape: bf16[2,32,64], index: 11, kind: input, shape index: {}]   ;;  %s4400_s12 = inlined_call_operand.vmem [shape: f32[2,1,64], index: 12, kind: input, shape index: {}]   ;;  %s4401_s13 = inlined_call_operand.vmem [shape: bf16[2,64,32], index: 13, kind: input, shape index: {}]   ;;  %s4402_s14 = inlined_call_operand.vmem [shape: f32[2,1,32], index: 14, kind: input, shape index: {}]   ;;  %s4403_s15 = inlined_call_operand.vmem [shape: f32[2,1,32], index: 15, kind: input, shape index: {}]   ;;  %s4404_s16 = inlined_call_operand.vmem [shape: f32[2,1,32], index: 16, kind: input, shape index: {}]   ;;  %s4405_s17 = inlined_call_operand.hbm [shape: f32[2,8,32], index: 17, kind: output, shape index: {}]  }
   0x1   :  { %4413 = sst [smem:[#allocation11_spill]] %s4388_s0 }
   0x2   :  { %4414 = sst [smem:[#allocation12_spill]] %s4389_s1 }
   0x3   :  { %4415 = sst [smem:[#allocation13_spill]] %s4390_s2 }
   0x4   :  { %4416 = sst [smem:[#allocation14_spill]] %s4391_s3 }
   0x5   :  { %4417 = sst [smem:[#allocation15_spill]] %s4392_s4 }
   0x6   :  { %4418 = sst [smem:[#allocation16_spill]] %s4393_s5 }
   0x7   :  { %4419 = sst [smem:[#allocation17_spill]] %s4394_s6 }
   0x8   :  { %4420 = sst [smem:[#allocation18_spill]] %s4395_s7 }
   0x9   :  { %4421 = sst [smem:[#allocation19_spill]] %s4396_s8 }
   0xa   :  { %4422 = sst [smem:[#allocation20_spill]] %s4405_s17 }
   0xb   :  { %22 = vsyncpa [#allocation3], 0  ;;  %s3929_s24 = smov 0   ;;  %s3931_s25 = smov 0  }
   0xc   :  { %s3933_s26 = smov 0  }
   0xd LB: > { %4423 = sst [smem:[#allocation5_spill]] %s3824_s24  ;;  %s37_s28 = sadd.s32 1, %s3828_s25  ;;  %s3832_s26 = sphi %s3933_s26, %s28_s26   ;;  %s3828_s25 = sphi %s3931_s25, %s4452_s25   ;;  %s3824_s24 = sphi %s3929_s24, %s4451_s24  }
   0xe   : > { %4424 = sst [smem:[#allocation6_spill]] %s3828_s25  ;;  %p38_p0 = scmp.ge.s32.totalorder %s37_s28, 2 }
   0xf   : > { %4425 = sst [smem:[#allocation7_spill]] %s3832_s26  ;;  %p3195_p1 = scmp.ge.s32.totalorder %s3832_s26, 1 }
  0x10   : > { %p644_p2 = scmp.lt.s32.totalorder %s3832_s26, 3  ;;  %s4454_s28 = smov (%p38_p0, %s37_s28), 0 }
  0x11   : > { %4426 = sst [smem:[#allocation8_spill]] %s4454_s28 }
  0x12   : > { %p645_p3 = pnand %p3195_p1, %p644_p2 }
  0x14   : > { %648 = sbr.rel (%p645_p3) target bundleno = 5056 (0x13c0), region = 88 }
  0x1b   : > { %p760_p4 = scmp.lt.s32.totalorder %s3824_s24, 1  ;;  %s4427_s1 = sld [smem:[#allocation12_spill]] }
  0x1c   : > { %s4429_s2 = sld [smem:[#allocation13_spill]]  ;;  %s4430_s3 = sld [smem:[#allocation14_spill]] }
  0x1d   : > { %s3952_s29 = scalar_select %p760_p4, %s3824_s24, 1 }
  0x1e   : > { %s4432_s4 = sld [smem:[#allocation15_spill]]  ;;  %s4433_s5 = sld [smem:[#allocation16_spill]] }
  0x1f   : > { %s3347_s0 = sshll.u32 %s3952_s29, 6  ;;  %s3202_s30 = sshll.u32 %s3952_s29, 2 }
  0x20   : > { %s4434_s6 = sld [smem:[#allocation17_spill]]  ;;  %s4436_s7 = sld [smem:[#allocation18_spill]] }
  0x21   : > { %s3959_s20 = scalar_lea.vmem %s4427_s1, %s3347_s0  ;;  %s822_s18 = scalar_lea.vmem %s4404_s16, %s3952_s29 }
  0x22   : > { %4428 = sst [smem:[#allocation9_spill]] %s3959_s20  ;;  %s3964_s23 = scalar_lea.vmem %s4429_s2, %s3347_s0 }
  0x23   : > { %s3969_s25 = scalar_lea.vmem %s4430_s3, %s3347_s0  ;;  %s3350_s20 = sshll.u32 %s3952_s29, 4 }
  0x24   : > { %4431 = sst [smem:[#allocation10_spill]] %s3969_s25  ;;  %s3974_s24 = scalar_lea.vmem %s4432_s4, %s3202_s30 }
  0x25   : > { %s3979_s1 = scalar_lea.vmem %s4433_s5, %s3202_s30  ;;  %s3352_s3 = sshll.u32 %s3952_s29, 5 }
  0x26   : > { %s3984_s2 = scalar_lea.vmem %s4434_s6, %s3202_s30  ;;  %s3994_s17 = scalar_lea.vmem %s4436_s7, %s3350_s20 }
  0x27   : > { %s4007_s6 = scalar_lea.vmem %s4399_s11, %s3350_s20  ;;  %s4017_s8 = scalar_lea.vmem %s4401_s13, %s3352_s3 }
  0x28   : > { %s816_s5 = scalar_lea.vmem %s4402_s14, %s3952_s29  ;;  %s819_s30 = scalar_lea.vmem %s4403_s15, %s3952_s29 }
  0x29   : > { %s4437_s27 = sld [smem:[#allocation5_spill]] }
  0x2f   : > { %p3211_p5 = scmp.ne.s32.totalorder %s4437_s27, 0 }
  0x30   : > { %s4438_s7 = sld [smem:[#allocation11_spill]] (!%p3211_p5)  ;;  %vm831_vm0 = vcmask (!%p3211_p5), 261120  }
  0x31   : > { %828 = sbr.rel (%p3211_p5) target bundleno = 56 (0x38), region = 92 }
  0x36   : > { %v829_v0 = vld [vmem:[%s4438_s7] sm:$0xff] (!%p3211_p5)  ;;  %v830_v1 = vld [vmem:[%s4438_s7 + $0x8] sm:$0xff] (!%p3211_p5) }
  0x37   : > { %832 = vst.msk [vmem:[#allocation2] sm:$0xff] (!%p3211_p5), %vm831_vm0, %v829_v0  ;;  %833 = vst.msk [vmem:[#allocation2 + $0x8] sm:$0xff] (!%p3211_p5), %vm831_vm0, %v830_v1 }
  0x38 PF: > { %s4439_s21 = sld [smem:[#allocation9_spill]]  ;;  %v3708_v2 = vld [vmem:[%s3964_s23] sm:$0xff]   ;;  %v3834_v3 = vmov 0.0   ;;  %s4440_s0 = sld [smem:[#allocation10_spill]]  ;;  %v3709_v4 = vld [vmem:[%s3964_s23 + $0x8] sm:$0xff]   ;;  %vm3835_vm1 = vmmov 0  }
  0x39   : > { %3445 = vmatprep.subr.bf16.mxu1 %v3834_v3  ;;  %3437 = vmatprep.subr.bf16.mxu0 %v3834_v3  ;;  %vm861_vm2 = vcmask 261120   ;;  %v3216_v12 = vld [vmem:[%s3979_s1] ss:$0 sm:$0xff]  ;;  %vm1040_vm3 = vcmask 64512   ;;  %vm1162_vm4 = vcmask 1043456   ;;  %s4443_s4 = scalar_lea.vmem %s4397_s9, %s3952_s29  ;;  %s4444_s20 = scalar_lea.vmem %s4398_s10, %s3952_s29  ;;  %vm2862_vm5 = vcmask 523264  }
  0x3a   : > { %3446 = vmatpush3.bf16.msra.mxu1 %v3708_v2  ;;  %3449 = vmatprep.mubr.msk.bf16.mxu1 %vm3835_vm1, %v3834_v3  ;;  %v3212_v17 = vld [vmem:[%s3974_s24] ss:$0 sm:$0xff]  ;;  %s4445_s28 = scalar_lea.vmem %s4400_s12, %s3952_s29 }
  0x3b   : > { %3447 = vmatprep.subr.bf16.mxu1 %v3834_v3  ;;  %3441 = vmatprep.mubr.msk.bf16.mxu0 %vm3835_vm1, %v3834_v3  ;;  %v3220_v29 = vld [vmem:[%s3984_s2] ss:$0 sm:$0xff] }
  0x3e   : > { %v3710_v5 = vld [vmem:[%s4439_s21] sm:$0xff]   ;;  %v835_v7 = vld [vmem:[#allocation2 + $0x8] sm:$0xff]  ;;  %3448 = vmatpush3.bf16.msra.mxu1 %v3709_v4 }
  0x3f   : > { %v834_v6 = vld [vmem:[#allocation2] sm:$0xff]  ;;  %3438 = vmatpush3.bf16.msra.mxu0 %v3710_v5  ;;  %v3711_v8 = vld [vmem:[%s4439_s21 + $0x8] sm:$0xff]   ;;  %3461 = vmatprep.subr.bf16.mxu1 %v3834_v3 }
  0x40   : > { %v4049_v9 = vpack.c.bf16 %v835_v7, %v834_v6  ;;  %3439 = vmatprep.subr.bf16.mxu0 %v3834_v3  ;;  %v3712_v10 = vld [vmem:[%s4440_s0] sm:$0xff]   ;;  %v3713_v11 = vld [vmem:[%s4440_s0 + $0x8] sm:$0xff]   ;;  %v3714_v6 = vld [vmem:[%s3964_s23 + $0x10] sm:$0xff]  }
  0x42   : > { %3450 = vmatmul.mubr.msk.bf16.vlgmr.msra.gmra.mrb[0].mxu1 %vm861_vm2, %v4049_v9 }
  0x43   : > { %3440 = vmatpush3.bf16.msra.mxu0 %v3711_v8  ;;  %3463 = vmatprep.mubr.msk.bf16.mxu1 %vm3835_vm1, %v3834_v3 }
  0x44   : > { %3453 = vmatprep.subr.bf16.mxu0 %v3834_v3 }
  0x46   : > { %3442 = vmatmul.mubr.msk.bf16.vlgmr.msra.gmra.mrb[0].mxu0 %vm861_vm2, %v4049_v9 }
  0x47   : > { %3454 = vmatpush3.bf16.msra.mxu0 %v3712_v10  ;;  %3457 = vmatprep.mubr.msk.bf16.mxu0 %vm3835_vm1, %v3834_v3 }
  0x48   : > { %3455 = vmatprep.subr.bf16.mxu0 %v3834_v3 }
  0x4b   : > { %3456 = vmatpush3.bf16.msra.mxu0 %v3713_v11  ;;  %v3715_v11 = vld [vmem:[%s3964_s23 + $0x18] sm:$0xff]  }
  0x4c   : > { %3467 = vmatprep.subr.bf16.mxu0 %v3834_v3 }
  0x4e   : > { %3458 = vmatmul.mubr.msk.bf16.vlgmr.msra.gmra.mrb[4].mxu0 %vm861_vm2, %v4049_v9 }
  0x4f   : > { %3469 = vmatprep.mubr.msk.bf16.mxu0 %vm3835_vm1, %v3834_v3 }
 0x115   : > { %v963_v13 = vpop.f32.mrb[0].mxu1 }
 0x116   : > { %v964_v14 = vadd.f32 %v3216_v12, %v963_v13  ;;  %v3451_v15 = vpop.f32.mrb[1].mxu1 }
 0x117   : > { %v966_v16 = vpop.f32.mrb[2].mxu1  ;;  %v3718_v15 = vld [vmem:[%s4440_s0 + $0x10] sm:$0xff]  }
 0x118   : > { %v1036_v19 = vpack.c.bf16 %v964_v14, %v964_v14  ;;  %v967_v20 = vadd.f32 %v3216_v12, %v966_v16  ;;  %v3452_v21 = vpop.f32.mrb[3].mxu1  ;;  %v3716_v12 = vld [vmem:[%s4439_s21 + $0x10] sm:$0xff]   ;;  %v3717_v14 = vld [vmem:[%s4439_s21 + $0x18] sm:$0xff]  }
 0x119   : > { %v899_v18 = vpop.f32.mrb[0].mxu0  ;;  %v3719_v16 = vld [vmem:[%s4440_s0 + $0x18] sm:$0xff]  }
 0x11a   : > { %v3443_v22 = vpop.f32.mrb[1].mxu0  ;;  %v1045_v24 = vsel %vm1040_vm3, %v1036_v19, 0  ;;  %v1037_v25 = vpack.c.bf16 %v967_v20, %v967_v20  ;;  %v900_v26 = vadd.f32 %v3212_v17, %v899_v18 }
 0x11b   : > { %v902_v23 = vpop.f32.mrb[2].mxu0  ;;  %3462 = vmatpush3.bf16.xpose.msra.mxu1 %v1045_v24 }
 0x11c   : > { %v3444_v27 = vpop.f32.mrb[3].mxu0  ;;  %v1091_v28 = vsel %vm1040_vm3, %v1037_v25, 0  ;;  %3473 = vmatprep.subr.bf16.mxu1 %v3834_v3  ;;  %v1034_v30 = vpack.c.bf16 %v900_v26, %v900_v26  ;;  %v903_v31 = vadd.f32 %v3212_v17, %v902_v23  ;;  %v3242_v25 = vld [vmem:[%s3979_s1 + $0x1] ss:$0 sm:$0xff] }
 0x11d   : > { %3468 = vmatpush3.bf16.xpose.msra.mxu0 %v1091_v28 }
 0x11e   : > { %3479 = vmatprep.subr.bf16.mxu0 %v3834_v3  ;;  %v1035_v36 = vpack.c.bf16 %v903_v31, %v903_v31  ;;  %v3233_v31 = vld [vmem:[%s3974_s24 + $0x1] ss:$0 sm:$0xff] }
 0x121   : > { %v1027_v32 = vpop.f32.mrb[4].mxu0 }
 0x122   : > { %v1028_v33 = vadd.f32 %v3220_v29, %v1027_v32  ;;  %v3459_v34 = vpop.f32.mrb[5].mxu0  ;;  %3464 = vmatmul.mubr.msk.bf16.vlgmr.msra.gmra.mrb[4].mxu1 %vm1040_vm3, %v1034_v30 }
 0x123   : > { %v1030_v35 = vpop.f32.mrb[6].mxu0  ;;  %3475 = vmatprep.mubr.msk.bf16.mxu1 %vm3835_vm1, %v3834_v3 }
 0x124   : > { %v1038_v37 = vpack.c.bf16 %v1028_v33, %v1028_v33  ;;  %v1031_v38 = vadd.f32 %v3220_v29, %v1030_v35  ;;  %v3460_v39 = vpop.f32.mrb[7].mxu0  ;;  %3470 = vmatmul.mubr.msk.bf16.vlgmr.msra.gmra.mrb[8].mxu0 %vm1040_vm3, %v1035_v36 }
 0x125   : > { %3481 = vmatprep.mubr.msk.bf16.mxu0 %vm3835_vm1, %v3834_v3 }
 0x126   : > { %v1164_v40 = vsel %vm1162_vm4, %v1038_v37, 0  ;;  %v1039_v41 = vpack.c.bf16 %v1031_v38, %v1031_v38 }
 0x127   : > { %3474 = vmatpush3.bf16.msra.mxu1 %v1164_v40 }
 0x128   : > { %v1210_v42 = vsel %vm1162_vm4, %v1039_v41, 0  ;;  %3485 = vmatprep.subr.bf16.mxu1 %v3834_v3 }
 0x129   : > { %3480 = vmatpush3.bf16.msra.mxu0 %v1210_v42 }
 0x12a   : > { %3493 = vmatprep.subr.bf16.mxu0 %v3834_v3 }
 0x1f5   : > { %v1081_v43 = vpop.f32.mrb[4].mxu1 }
 0x1f6   : > { %v3465_v44 = vpop.f32.mrb[5].mxu1  ;;  %v1133_v51 = vmul.f32 0.35355338, %v1081_v43 }
 0x1f7   : > { %v1084_v45 = vpop.f32.mrb[6].mxu1  ;;  %v1127_v46 = vpop.f32.mrb[8].mxu0 }
 0x1f8   : > { %v1134_v47 = vmul.f32 0.35355338, %v1127_v46  ;;  %v3466_v48 = vpop.f32.mrb[7].mxu1  ;;  %v3471_v49 = vpop.f32.mrb[9].mxu0  ;;  %v1135_v54 = vsel %vm1040_vm3, %v1133_v51, -inf }
 0x1f9   : > { %v1130_v50 = vpop.f32.mrb[10].mxu0  ;;  %v3251_v46 = vld [vmem:[%s3984_s2 + $0x1] ss:$0 sm:$0xff] }
 0x1fa   : > { %v3472_v52 = vpop.f32.mrb[11].mxu0  ;;  %v1138_v53 = vsel %vm1040_vm3, %v1134_v47, -inf }
 0x1fb   : > { %1139 = vmax.xlane.f32.xlu0 %v1138_v53 }
 0x1ff   : > { %1136 = vmax.xlane.f32.xlu0 %v1135_v54 }
 0x288   : > { %v1140_v55 = vpop.xlane.xlu0 %1139 }
 0x289   : > { %v1142_v56 = vsub.f32 %v1134_v47, %v1140_v55 }
 0x28b   : > { %v1145_v57 = vmul.f32 1.442695, %v1142_v56 }
 0x28c   : > { %v1137_v58 = vpop.xlane.xlu0 %1136 }
 0x28d   : > { %3738 = vpow2.f32 %v1145_v57  ;;  %v1141_v59 = vsub.f32 %v1133_v51, %v1137_v58 }
 0x28f   : > { %v1143_v60 = vmul.f32 1.442695, %v1141_v59 }
 0x291   : > { %3740 = vpow2.f32 %v1143_v60 }
 0x297   : > { %v3739_v61 = vpop.eup %3738 }
 0x298   : > { %v1150_v62 = vsel %vm1040_vm3, %v3739_v61, 0.0 }
 0x299   : > { %1151 = vadd.xlane.f32.xlu1 %v1150_v62 }
 0x29b   : > { %v3741_v63 = vpop.eup %3740 }
 0x29c   : > { %v1147_v0 = vsel %vm1040_vm3, %v3741_v63, 0.0 }
 0x29d   : > { %1148 = vadd.xlane.f32.xlu1 %v1147_v0 }
 0x326   : > { %v1152_v1 = vpop.xlane.xlu1 %1151 }
 0x327   : > { %3742 = vrcp.f32 %v1152_v1 }
 0x32a   : > { %v1149_v2 = vpop.xlane.xlu1 %1148 }
 0x32b   : > { %3744 = vrcp.f32 %v1149_v2 }
 0x331   : > { %v3743_v4 = vpop.eup %3742 }
 0x332   : > { %v1156_v5 = vmul.f32 %v3743_v4, %v3739_v61 }
 0x334   : > { %v1158_v7 = vpack.c.bf16 %v1156_v5, %v1156_v5 }
 0x335   : > { %v3745_v8 = vpop.eup %3744 }
 0x336   : > { %v1155_v10 = vmul.f32 %v3745_v8, %v3741_v63  ;;  %3482 = vmatmul.mubr.msk.bf16.vlgmr.msra.gmra.mrb[12].mxu0 %vm1040_vm3, %v1158_v7 }
 0x337   : > { %3494 = vmatpush3.bf16.msra.mxu0 %v3714_v6  ;;  %3497 = vmatprep.mubr.msk.bf16.mxu0 %vm3835_vm1, %v3834_v3 }
 0x338   : > { %v1157_v13 = vpack.c.bf16 %v1155_v10, %v1155_v10  ;;  %3495 = vmatprep.subr.bf16.mxu0 %v3834_v3 }
 0x33a   : > { %3476 = vmatmul.mubr.msk.bf16.vlgmr.msra.gmra.mrb[8].mxu1 %vm1040_vm3, %v1157_v13 }
 0x33b   : > { %3496 = vmatpush3.bf16.msra.mxu0 %v3715_v11  ;;  %3486 = vmatpush3.bf16.msra.mxu1 %v3716_v12 }
 0x33c   : > { %3487 = vmatprep.subr.bf16.mxu1 %v3834_v3  ;;  %3489 = vmatprep.mubr.msk.bf16.mxu1 %vm3835_vm1, %v3834_v3 }
 0x33d   : > { %3509 = vmatprep.subr.bf16.mxu0 %v3834_v3 }
 0x33e   : > { %3498 = vmatmul.mubr.msk.bf16.vlgmr.msra.gmra.mrb[16].mxu0 %vm861_vm2, %v4049_v9 }
 0x33f   : > { %3488 = vmatpush3.bf16.msra.mxu1 %v3717_v14  ;;  %3511 = vmatprep.mubr.msk.bf16.mxu0 %vm3835_vm1, %v3834_v3 }
 0x340   : > { %3501 = vmatprep.subr.bf16.mxu1 %v3834_v3 }
 0x342   : > { %3490 = vmatmul.mubr.msk.bf16.vlgmr.msra.gmra.mrb[12].mxu1 %vm861_vm2, %v4049_v9 }
 0x343   : > { %3505 = vmatprep.mubr.msk.bf16.mxu1 %vm3835_vm1, %v3834_v3  ;;  %3502 = vmatpush3.bf16.msra.mxu1 %v3718_v15 }
 0x344   : > { %3503 = vmatprep.subr.bf16.mxu1 %v3834_v3 }
 0x347   : > { %3504 = vmatpush3.bf16.msra.mxu1 %v3719_v16 }
 0x348   : > { %3515 = vmatprep.subr.bf16.mxu1 %v3834_v3 }
 0x34a   : > { %3506 = vmatmul.mubr.msk.bf16.vlgmr.msra.gmra.mrb[16].mxu1 %vm861_vm2, %v4049_v9 }
 0x34b   : > { %3517 = vmatprep.mubr.msk.bf16.mxu1 %vm3835_vm1, %v3834_v3 }
 0x409   : > { %v4121_v17 = vpop.f32.mrb[12].mxu0 }
 0x40a   : > { %v3483_v18 = vpop.f32.mrb[13].mxu0 }
 0x40b   : > { %v1249_v19 = vpop.f32.mrb[14].mxu0 }
 0x40c   : > { %v3484_v20 = vpop.f32.mrb[15].mxu0 }
 0x40d   : > { %v4123_v21 = vpop.f32.mrb[8].mxu1 }
 0x40e   : > { %v1252_v22 = vpack.c.bf16 %v4121_v17, %v4123_v21  ;;  %v3477_v23 = vpop.f32.mrb[9].mxu1 }
 0x40f   : > { %v1203_v24 = vpop.f32.mrb[10].mxu1  ;;  %v3259_v23 = vld [vmem:[%s3994_s17 + $0x4] sm:$0xf] }
 0x410   : > { %v3478_v26 = vpop.f32.mrb[11].mxu1 }
 0x411   : > { %v1379_v27 = vpop.f32.mrb[16].mxu0  ;;  %v1253_v26 = vld [vmem:[%s3994_s17] sm:$0xf] }
 0x412   : > { %v1380_v28 = vadd.f32 %v3242_v25, %v1379_v27  ;;  %v3499_v29 = vpop.f32.mrb[17].mxu0 }
 0x413   : > { %v1382_v30 = vpop.f32.mrb[18].mxu0  ;;  %v1675_v29 = vsel %vm1162_vm4, %v3259_v23, 0 }
 0x414   : > { %v1454_v32 = vpack.c.bf16 %v1380_v28, %v1380_v28  ;;  %v1383_v33 = vadd.f32 %v3242_v25, %v1382_v30  ;;  %v3500_v34 = vpop.f32.mrb[19].mxu0 }
 0x415   : > { %v1313_v35 = vpop.f32.mrb[12].mxu1 }
 0x416   : > { %v1462_v36 = vsel %vm1040_vm3, %v1454_v32, 0  ;;  %v1455_v37 = vpack.c.bf16 %v1383_v33, %v1383_v33  ;;  %v1314_v38 = vadd.f32 %v3233_v31, %v1313_v35  ;;  %v3491_v39 = vpop.f32.mrb[13].mxu1  ;;  %v3720_v32 = vld [vmem:[%s3964_s23 + $0x20] sm:$0xff]   ;;  %v3721_v33 = vld [vmem:[%s3964_s23 + $0x28] sm:$0xff]  }
 0x417   : > { %3510 = vmatpush3.bf16.xpose.msra.mxu0 %v1462_v36  ;;  %v1316_v40 = vpop.f32.mrb[14].mxu1  ;;  %v3722_v35 = vld [vmem:[%s4439_s21 + $0x20] sm:$0xff]  }
 0x418   : > { %v1508_v41 = vsel %vm1040_vm3, %v1455_v37, 0  ;;  %v3492_v42 = vpop.f32.mrb[15].mxu1  ;;  %3521 = vmatprep.subr.bf16.mxu0 %v3834_v3  ;;  %v1452_v43 = vpack.c.bf16 %v1314_v38, %v1314_v38  ;;  %v1317_v44 = vadd.f32 %v3233_v31, %v1316_v40  ;;  %v1722_v31 = vsel %vm1162_vm4, %v1253_v26, 0 }
 0x419   : > { %3516 = vmatpush3.bf16.xpose.msra.mxu1 %v1508_v41  ;;  %v3723_v41 = vld [vmem:[%s4439_s21 + $0x28] sm:$0xff]  }
 0x41a   : > { %3527 = vmatprep.subr.bf16.mxu1 %v3834_v3  ;;  %v1453_v45 = vpack.c.bf16 %v1317_v44, %v1317_v44 }
 0x41d   : > { %v1445_v47 = vpop.f32.mrb[16].mxu1 }
 0x41e   : > { %3512 = vmatmul.mubr.msk.bf16.vlgmr.msra.gmra.mrb[20].mxu0 %vm1040_vm3, %v1452_v43  ;;  %v1446_v48 = vadd.f32 %v3251_v46, %v1445_v47  ;;  %v3507_v49 = vpop.f32.mrb[17].mxu1  ;;  %v3724_v43 = vld [vmem:[%s4440_s0 + $0x20] sm:$0xff]   ;;  %v3725_v47 = vld [vmem:[%s4440_s0 + $0x28] sm:$0xff]  }
 0x41f   : > { %3523 = vmatprep.mubr.msk.bf16.mxu0 %vm3835_vm1, %v3834_v3  ;;  %v1448_v50 = vpop.f32.mrb[18].mxu1 }
 0x420   : > { %3518 = vmatmul.mubr.msk.bf16.vlgmr.msra.gmra.mrb[20].mxu1 %vm1040_vm3, %v1453_v45  ;;  %v1456_v51 = vpack.c.bf16 %v1446_v48, %v1446_v48  ;;  %v1449_v52 = vadd.f32 %v3251_v46, %v1448_v50  ;;  %v3508_v53 = vpop.f32.mrb[19].mxu1  ;;  %v3276_v48 = vld [vmem:[%s3979_s1 + $0x2] ss:$0 sm:$0xff] }
 0x421   : > { %3529 = vmatprep.mubr.msk.bf16.mxu1 %vm3835_vm1, %v3834_v3 }
 0x422   : > { %v1580_v54 = vsel %vm1162_vm4, %v1456_v51, 0  ;;  %v1457_v55 = vpack.c.bf16 %v1449_v52, %v1449_v52 }
 0x423   : > { %3522 = vmatpush3.bf16.msra.mxu0 %v1580_v54 }
 0x424   : > { %v1626_v56 = vsel %vm1162_vm4, %v1457_v55, 0  ;;  %3533 = vmatprep.subr.bf16.mxu0 %v3834_v3 }
 0x425   : > { %3528 = vmatpush3.bf16.msra.mxu1 %v1626_v56 }
 0x426   : > { %3539 = vmatprep.subr.bf16.mxu1 %v3834_v3 }
 0x4f1   : > { %v1498_v57 = vpop.f32.mrb[20].mxu0 }
 0x4f2   : > { %v1550_v58 = vmul.f32 0.35355338, %v1498_v57  ;;  %v3513_v59 = vpop.f32.mrb[21].mxu0 }
 0x4f3   : > { %v1501_v60 = vpop.f32.mrb[22].mxu0  ;;  %v1544_v61 = vpop.f32.mrb[20].mxu1 }
 0x4f4   : > { %v1551_v62 = vmul.f32 0.35355338, %v1544_v61  ;;  %v3514_v63 = vpop.f32.mrb[23].mxu0  ;;  %v3519_v0 = vpop.f32.mrb[21].mxu1  ;;  %v1552_v1 = vsel %vm1040_vm3, %v1550_v58, -inf }
 0x4f5   : > { %v1547_v2 = vpop.f32.mrb[22].mxu1  ;;  %1553 = vmax.xlane.f32.xlu0 %v1552_v1  ;;  %v3267_v1 = vld [vmem:[%s3974_s24 + $0x2] ss:$0 sm:$0xff] }
 0x4f6   : > { %v3520_v4 = vpop.f32.mrb[23].mxu1  ;;  %v1555_v5 = vsel %vm1040_vm3, %v1551_v62, -inf }
 0x4f7   : > { %1556 = vmax.xlane.f32.xlu1 %v1555_v5 }
 0x582   : > { %v1554_v6 = vpop.xlane.xlu0 %1553 }
 0x583   : > { %v1558_v7 = vsub.f32 %v1550_v58, %v1554_v6 }
 0x584   : > { %v1557_v8 = vpop.xlane.xlu1 %1556 }
 0x585   : > { %v1560_v10 = vmul.f32 1.442695, %v1558_v7  ;;  %v1559_v11 = vsub.f32 %v1551_v62, %v1557_v8 }
 0x587   : > { %3746 = vpow2.f32 %v1560_v10  ;;  %v1562_v12 = vmul.f32 1.442695, %v1559_v11 }
 0x589   : > { %3748 = vpow2.f32 %v1562_v12  ;;  %v3285_v12 = vld [vmem:[%s3984_s2 + $0x2] ss:$0 sm:$0xff] }
 0x591   : > { %v3747_v13 = vpop.eup %3746 }
 0x592   : > { %v1564_v14 = vsel %vm1040_vm3, %v3747_v13, 0.0 }
 0x593   : > { %v3749_v15 = vpop.eup %3748  ;;  %1565 = vadd.xlane.f32.xlu0 %v1564_v14 }
 0x594   : > { %v1567_v16 = vsel %vm1040_vm3, %v3749_v15, 0.0 }
 0x595   : > { %1568 = vadd.xlane.f32.xlu1 %v1567_v16 }
 0x620   : > { %v1566_v18 = vpop.xlane.xlu0 %1565 }
 0x621   : > { %3750 = vrcp.f32 %v1566_v18 }
 0x622   : > { %v1569_v19 = vpop.xlane.xlu1 %1568 }
 0x623   : > { %3752 = vrcp.f32 %v1569_v19 }
 0x62b   : > { %v3751_v20 = vpop.eup %3750 }
 0x62c   : > { %v1572_v24 = vmul.f32 %v3751_v20, %v3747_v13 }
 0x62d   : > { %v3753_v25 = vpop.eup %3752 }
 0x62e   : > { %v1573_v27 = vmul.f32 %v3753_v25, %v3749_v15  ;;  %v1574_v28 = vpack.c.bf16 %v1572_v24, %v1572_v24 }
 0x630   : > { %3524 = vmatmul.mubr.msk.bf16.vlgmr.msra.gmra.mrb[24].mxu0 %vm1040_vm3, %v1574_v28  ;;  %v1575_v30 = vpack.c.bf16 %v1573_v27, %v1573_v27 }
 0x631   : > { %3534 = vmatpush3.bf16.msra.mxu0 %v1675_v29  ;;  %3535 = vmatprep.mubr.msk.bf16.mxu0 %vm3835_vm1, %v3834_v3 }
 0x632   : > { %3530 = vmatmul.mubr.msk.bf16.vlgmr.msra.gmra.mrb[24].mxu1 %vm1040_vm3, %v1575_v30  ;;  %3545 = vmatprep.subr.bf16.mxu0 %v3834_v3 }
 0x633   : > { %3540 = vmatpush3.bf16.msra.mxu1 %v1722_v31  ;;  %3541 = vmatprep.mubr.msk.bf16.mxu1 %vm3835_vm1, %v3834_v3 }
 0x634   : > { %3553 = vmatprep.subr.bf16.mxu1 %v3834_v3 }
 0x63a   : > { %3542 = vmatmul.mubr.msk.bf16.vlgmr.msra.gmra.mrb[28].mxu1 %vm1040_vm3, %v1252_v22 }
 0x63b   : > { %3554 = vmatpush3.bf16.msra.mxu1 %v3720_v32  ;;  %3557 = vmatprep.mubr.msk.bf16.mxu1 %vm3835_vm1, %v3834_v3 }
 0x63c   : > { %3555 = vmatprep.subr.bf16.mxu1 %v3834_v3 }
 0x63f   : > { %3556 = vmatpush3.bf16.msra.mxu1 %v3721_v33 }
 0x640   : > { %3569 = vmatprep.subr.bf16.mxu1 %v3834_v3 }
 0x642   : > { %3558 = vmatmul.mubr.msk.bf16.vlgmr.msra.gmra.mrb[32].mxu1 %vm861_vm2, %v4049_v9 }
 0x643   : > { %3571 = vmatprep.mubr.msk.bf16.mxu1 %vm3835_vm1, %v3834_v3 }
 0x703   : > { %v1616_v17 = vpop.f32.mrb[24].mxu0 }
 0x704   : > { %v3525_v21 = vpop.f32.mrb[25].mxu0 }
 0x705   : > { %v1619_v22 = vpop.f32.mrb[26].mxu0  ;;  %v1662_v34 = vpop.f32.mrb[24].mxu1 }
 0x706   : > { %v1668_v36 = vpack.c.bf16 %v1662_v34, %v1616_v17  ;;  %v3526_v37 = vpop.f32.mrb[27].mxu0  ;;  %v3531_v38 = vpop.f32.mrb[25].mxu1 }
 0x707   : > { %v1665_v39 = vpop.f32.mrb[26].mxu1 }
 0x708   : > { %v3532_v40 = vpop.f32.mrb[27].mxu1  ;;  %3536 = vmatmul.mubr.msk.bf16.vlgmr.msra.gmra.mrb[28].mxu0 %vm1040_vm3, %v1668_v36 }
 0x709   : > { %3546 = vmatpush3.bf16.msra.mxu0 %v3722_v35  ;;  %3549 = vmatprep.mubr.msk.bf16.mxu0 %vm3835_vm1, %v3834_v3 }
 0x70a   : > { %3547 = vmatprep.subr.bf16.mxu0 %v3834_v3 }
 0x70d   : > { %v1758_v42 = vpop.f32.mrb[28].mxu1  ;;  %3548 = vmatpush3.bf16.msra.mxu0 %v3723_v41 }
 0x70e   : > { %v3543_v44 = vpop.f32.mrb[29].mxu1  ;;  %3561 = vmatprep.subr.bf16.mxu0 %v3834_v3 }
 0x70f   : > { %v1761_v45 = vpop.f32.mrb[30].mxu1 }
 0x710   : > { %v3544_v46 = vpop.f32.mrb[31].mxu1  ;;  %3550 = vmatmul.mubr.msk.bf16.vlgmr.msra.gmra.mrb[32].mxu0 %vm861_vm2, %v4049_v9 }
 0x711   : > { %3562 = vmatpush3.bf16.msra.mxu0 %v3724_v43  ;;  %3565 = vmatprep.mubr.msk.bf16.mxu0 %vm3835_vm1, %v3834_v3 }
 0x712   : > { %3563 = vmatprep.subr.bf16.mxu0 %v3834_v3 }
 0x715   : > { %v1890_v49 = vpop.f32.mrb[32].mxu1  ;;  %3564 = vmatpush3.bf16.msra.mxu0 %v3725_v47 }
 0x716   : > { %v1891_v50 = vadd.f32 %v3276_v48, %v1890_v49  ;;  %v3559_v51 = vpop.f32.mrb[33].mxu1  ;;  %3575 = vmatprep.subr.bf16.mxu0 %v3834_v3 }
 0x717   : > { %v1893_v52 = vpop.f32.mrb[34].mxu1 }
 0x718   : > { %v1965_v53 = vpack.c.bf16 %v1891_v50, %v1891_v50  ;;  %v1894_v54 = vadd.f32 %v3276_v48, %v1893_v52  ;;  %v3560_v55 = vpop.f32.mrb[35].mxu1  ;;  %3566 = vmatmul.mubr.msk.bf16.vlgmr.msra.gmra.mrb[36].mxu0 %vm861_vm2, %v4049_v9  ;;  %v3293_v48 = vld [vmem:[%s3994_s17 + $0x8] sm:$0xf] }
 0x719   : > { %3577 = vmatprep.mubr.msk.bf16.mxu0 %vm3835_vm1, %v3834_v3  ;;  %v3728_v55 = vld [vmem:[%s4439_s21 + $0x30] sm:$0xff]  }
 0x71a   : > { %v1973_v56 = vsel %vm1040_vm3, %v1965_v53, 0  ;;  %v1966_v57 = vpack.c.bf16 %v1894_v54, %v1894_v54  ;;  %v2186_v53 = vsel %vm1162_vm4, %v3293_v48, 0 }
 0x71b   : > { %3570 = vmatpush3.bf16.xpose.msra.mxu1 %v1973_v56  ;;  %v3729_v56 = vld [vmem:[%s4439_s21 + $0x38] sm:$0xff]  }
 0x71c   : > { %v2019_v58 = vsel %vm1040_vm3, %v1966_v57, 0  ;;  %3581 = vmatprep.subr.bf16.mxu1 %v3834_v3 }
 0x71e   : > { %3576 = vmatpush3.bf16.xpose.msra.mxu0 %v2019_v58 }
 0x71f   : > { %3587 = vmatprep.subr.bf16.mxu0 %v3834_v3 }
 0x7db   : > { %v1711_v59 = vpop.f32.mrb[28].mxu0 }
 0x7dc   : > { %v4198_v60 = vadd.f32 %v1758_v42, %v1711_v59  ;;  %v3537_v61 = vpop.f32.mrb[29].mxu0 }
 0x7dd   : > { %v1714_v62 = vpop.f32.mrb[30].mxu0 }
 0x7de   : > { %v4200_v63 = vadd.f32 %v1761_v45, %v1714_v62  ;;  %v3538_v0 = vpop.f32.mrb[31].mxu0  ;;  %v3726_v62 = vld [vmem:[%s3964_s23 + $0x30] sm:$0xff]  }
 0x7e3   : > { %v1824_v2 = vpop.f32.mrb[32].mxu0 }
 0x7e4   : > { %v1825_v4 = vadd.f32 %v3267_v1, %v1824_v2  ;;  %v3551_v5 = vpop.f32.mrb[33].mxu0 }
 0x7e5   : > { %v1827_v6 = vpop.f32.mrb[34].mxu0 }
 0x7e6   : > { %v1963_v7 = vpack.c.bf16 %v1825_v4, %v1825_v4  ;;  %v1828_v8 = vadd.f32 %v3267_v1, %v1827_v6  ;;  %v3552_v10 = vpop.f32.mrb[35].mxu0  ;;  %v3727_v6 = vld [vmem:[%s3964_s23 + $0x38] sm:$0xff]   ;;  %s4441_s23 = sld [smem:[#allocation19_spill]] }
 0x7e8   : > { %v1964_v11 = vpack.c.bf16 %v1828_v8, %v1828_v8  ;;  %3572 = vmatmul.mubr.msk.bf16.vlgmr.msra.gmra.mrb[36].mxu1 %vm1040_vm3, %v1963_v7  ;;  %v3730_v7 = vld [vmem:[%s4440_s0 + $0x30] sm:$0xff]   ;;  %v3731_v8 = vld [vmem:[%s4440_s0 + $0x38] sm:$0xff]  }
 0x7e9   : > { %3583 = vmatprep.mubr.msk.bf16.mxu1 %vm3835_vm1, %v3834_v3 }
 0x7ea   : > { %3578 = vmatmul.mubr.msk.bf16.vlgmr.msra.gmra.mrb[40].mxu0 %vm1040_vm3, %v1964_v11 }
 0x7eb   : > { %v1956_v13 = vpop.f32.mrb[36].mxu0  ;;  %3589 = vmatprep.mubr.msk.bf16.mxu0 %vm3835_vm1, %v3834_v3 }
 0x7ec   : > { %v1957_v14 = vadd.f32 %v3285_v12, %v1956_v13  ;;  %v3567_v15 = vpop.f32.mrb[37].mxu0 }
 0x7ed   : > { %v1959_v16 = vpop.f32.mrb[38].mxu0 }
 0x7ee   : > { %v1967_v18 = vpack.c.bf16 %v1957_v14, %v1957_v14  ;;  %v1960_v19 = vadd.f32 %v3285_v12, %v1959_v16  ;;  %v3568_v20 = vpop.f32.mrb[39].mxu0 }
 0x7f0   : > { %v2091_v23 = vsel %vm1162_vm4, %v1967_v18, 0  ;;  %v1968_v24 = vpack.c.bf16 %v1960_v19, %v1960_v19 }
 0x7f1   : > { %3582 = vmatpush3.bf16.msra.mxu1 %v2091_v23  ;;  %v3309_v23 = vld [vmem:[%s3979_s1 + $0x3] ss:$0 sm:$0xff]  ;;  %s4442_s1 = scalar_lea.vmem %s4441_s23, %s3952_s29 }
 0x7f2   : > { %v2137_v25 = vsel %vm1162_vm4, %v1968_v24, 0  ;;  %3593 = vmatprep.subr.bf16.mxu1 %v3834_v3 }
 0x7f3   : > { %3588 = vmatpush3.bf16.msra.mxu0 %v2137_v25 }
 0x7f4   : > { %3599 = vmatprep.subr.bf16.mxu0 %v3834_v3 }
 0x8bb   : > { %v2009_v26 = vpop.f32.mrb[36].mxu1 }
 0x8bc   : > { %v2061_v27 = vmul.f32 0.35355338, %v2009_v26  ;;  %v3573_v28 = vpop.f32.mrb[37].mxu1 }
 0x8bd   : > { %v2012_v29 = vpop.f32.mrb[38].mxu1  ;;  %v2055_v30 = vpop.f32.mrb[40].mxu0 }
 0x8be   : > { %v2062_v31 = vmul.f32 0.35355338, %v2055_v30  ;;  %v3574_v32 = vpop.f32.mrb[39].mxu1  ;;  %v3579_v33 = vpop.f32.mrb[41].mxu0  ;;  %v2063_v17 = vsel %vm1040_vm3, %v2061_v27, -inf }
 0x8bf   : > { %2064 = vmax.xlane.f32.xlu0 %v2063_v17  ;;  %v2058_v21 = vpop.f32.mrb[42].mxu0 }
 0x8c0   : > { %v3580_v22 = vpop.f32.mrb[43].mxu0  ;;  %v2066_v34 = vsel %vm1040_vm3, %v2062_v31, -inf }
 0x8c1   : > { %2067 = vmax.xlane.f32.xlu1 %v2066_v34  ;;  %v3318_v22 = vld [vmem:[%s3984_s2 + $0x3] ss:$0 sm:$0xff] }
 0x94c   : > { %v2065_v35 = vpop.xlane.xlu0 %2064 }
 0x94d   : > { %v2069_v36 = vsub.f32 %v2061_v27, %v2065_v35  ;;  %v3300_v27 = vld [vmem:[%s3974_s24 + $0x3] ss:$0 sm:$0xff]  ;;  %s3836_s24 = smov [#allocation2]  }
 0x94e   : > { %v2068_v37 = vpop.xlane.xlu1 %2067  ;;  %s2964_s23 = sshll.u32 %s3836_s24, 4  ;;  %s2965_s23 = int_to_ptr.vmem [resolvable:$true] %s2964_s23 }
 0x94f   : > { %v2071_v38 = vmul.f32 1.442695, %v2069_v36  ;;  %v2070_v39 = vsub.f32 %v2062_v31, %v2068_v37  ;;  %s3780_s29 = scalar_lea.vmem %s2965_s23, 256  ;;  %p3787_p10 = scmp.lt.s32.totalorder %s2965_s23, %s2965_s23 }
 0x950   : > { %p3781_p7 = scmp.ne.s32.totalorder %s2965_s23, %s3780_s29  ;;  %p3788_p11 = scmp.lt.s32.totalorder %s3780_s29, %s3780_s29 }
 0x951   : > { %3754 = vpow2.f32 %v2071_v38  ;;  %v2073_v40 = vmul.f32 1.442695, %v2070_v39 }
 0x952   : > { %p3789_p12 = por %p3788_p11, %p3787_p10 }
 0x953   : > { %3756 = vpow2.f32 %v2073_v40 }
 0x95b   : > { %v3755_v41 = vpop.eup %3754 }
 0x95c   : > { %v2075_v42 = vsel %vm1040_vm3, %v3755_v41, 0.0 }
 0x95d   : > { %v3757_v43 = vpop.eup %3756  ;;  %2076 = vadd.xlane.f32.xlu0 %v2075_v42 }
 0x95e   : > { %v2078_v44 = vsel %vm1040_vm3, %v3757_v43, 0.0 }
 0x95f   : > { %2079 = vadd.xlane.f32.xlu1 %v2078_v44 }
 0x9ea   : > { %v2077_v45 = vpop.xlane.xlu0 %2076 }
 0x9eb   : > { %3758 = vrcp.f32 %v2077_v45 }
 0x9ec   : > { %v2080_v46 = vpop.xlane.xlu1 %2079 }
 0x9ed   : > { %3760 = vrcp.f32 %v2080_v46 }
 0x9f5   : > { %v3759_v47 = vpop.eup %3758 }
 0x9f6   : > { %v2083_v49 = vmul.f32 %v3759_v47, %v3755_v41 }
 0x9f7   : > { %v3761_v50 = vpop.eup %3760 }
 0x9f8   : > { %v2084_v51 = vmul.f32 %v3761_v50, %v3757_v43  ;;  %v2085_v52 = vpack.c.bf16 %v2083_v49, %v2083_v49 }
 0x9fa   : > { %3584 = vmatmul.mubr.msk.bf16.vlgmr.msra.gmra.mrb[40].mxu1 %vm1040_vm3, %v2085_v52  ;;  %v2086_v54 = vpack.c.bf16 %v2084_v51, %v2084_v51 }
 0x9fb   : > { %3594 = vmatpush3.bf16.msra.mxu1 %v2186_v53  ;;  %3595 = vmatprep.mubr.msk.bf16.mxu1 %vm3835_vm1, %v3834_v3 }
 0x9fc   : > { %3590 = vmatmul.mubr.msk.bf16.vlgmr.msra.gmra.mrb[44].mxu0 %vm1040_vm3, %v2086_v54  ;;  %3607 = vmatprep.subr.bf16.mxu1 %v3834_v3 }
 0x9fd   : > { %3603 = vmatprep.mubr.msk.bf16.mxu0 %vm3835_vm1, %v3834_v3  ;;  %3600 = vmatpush3.bf16.msra.mxu0 %v3728_v55 }
 0x9fe   : > { %3601 = vmatprep.subr.bf16.mxu0 %v3834_v3 }
 0xa01   : > { %3602 = vmatpush3.bf16.msra.mxu0 %v3729_v56 }
 0xa02   : > { %3615 = vmatprep.subr.bf16.mxu0 %v3834_v3 }
 0xa04   : > { %3604 = vmatmul.mubr.msk.bf16.vlgmr.msra.gmra.mrb[48].mxu0 %vm861_vm2, %v4049_v9 }
 0xa05   : > { %3619 = vmatprep.mubr.msk.bf16.mxu0 %vm3835_vm1, %v3834_v3  ;;  %3616 = vmatpush3.bf16.msra.mxu0 %v3730_v7 }
 0xa06   : > { %3617 = vmatprep.subr.bf16.mxu0 %v3834_v3 }
 0xa09   : > { %3618 = vmatpush3.bf16.msra.mxu0 %v3731_v8  ;;  %v3326_v8 = vld [vmem:[%s3994_s17 + $0xc] sm:$0xf] }
 0xa0a   : > { %3629 = vmatprep.subr.bf16.mxu0 %v3834_v3 }
 0xa0c   : > { %3620 = vmatmul.mubr.msk.bf16.vlgmr.msra.gmra.mrb[52].mxu0 %vm861_vm2, %v4049_v9 }
 0xa0d   : > { %3631 = vmatprep.mubr.msk.bf16.mxu0 %vm3835_vm1, %v3834_v3 }
 0xacd   : > { %v2127_v57 = vpop.f32.mrb[40].mxu1 }
 0xace   : > { %v3585_v58 = vpop.f32.mrb[41].mxu1 }
 0xacf   : > { %v2130_v59 = vpop.f32.mrb[42].mxu1  ;;  %v2173_v61 = vpop.f32.mrb[44].mxu0 }
 0xad0   : > { %v2179_v0 = vpack.c.bf16 %v2173_v61, %v2127_v57  ;;  %v3586_v1 = vpop.f32.mrb[43].mxu1  ;;  %v3591_v2 = vpop.f32.mrb[45].mxu0 }
 0xad1   : > { %v2176_v4 = vpop.f32.mrb[46].mxu0 }
 0xad2   : > { %v3592_v5 = vpop.f32.mrb[47].mxu0  ;;  %3596 = vmatmul.mubr.msk.bf16.vlgmr.msra.gmra.mrb[44].mxu1 %vm1040_vm3, %v2179_v0 }
 0xad3   : > { %3608 = vmatpush3.bf16.msra.mxu1 %v3726_v62  ;;  %3611 = vmatprep.mubr.msk.bf16.mxu1 %vm3835_vm1, %v3834_v3 }
 0xad4   : > { %3609 = vmatprep.subr.bf16.mxu1 %v3834_v3 }
 0xad7   : > { %3610 = vmatpush3.bf16.msra.mxu1 %v3727_v6  ;;  %v2290_v10 = vpop.f32.mrb[48].mxu0 }
 0xad8   : > { %3623 = vmatprep.subr.bf16.mxu1 %v3834_v3  ;;  %v3605_v11 = vpop.f32.mrb[49].mxu0  ;;  %v2291_v32 = vadd.f32 %v3300_v27, %v2290_v10 }
 0xad9   : > { %v2293_v12 = vpop.f32.mrb[50].mxu0 }
 0xada   : > { %3612 = vmatmul.mubr.msk.bf16.vlgmr.msra.gmra.mrb[48].mxu1 %vm861_vm2, %v4049_v9  ;;  %v3606_v13 = vpop.f32.mrb[51].mxu0  ;;  %v2294_v17 = vadd.f32 %v3300_v27, %v2293_v12 }
 0xadb   : > { %3625 = vmatprep.mubr.msk.bf16.mxu1 %vm3835_vm1, %v3834_v3 }
 0xadc   : > { %v2430_v21 = vpack.c.bf16 %v2294_v17, %v2294_v17 }
 0xadf   : > { %v2422_v34 = vpop.f32.mrb[52].mxu0 }
 0xae0   : > { %v2423_v35 = vadd.f32 %v3318_v22, %v2422_v34  ;;  %v3621_v36 = vpop.f32.mrb[53].mxu0 }
 0xae1   : > { %v2425_v37 = vpop.f32.mrb[54].mxu0  ;;  %v3779_v36 = vld [vmem:[#allocation2 + $0x8] sm:$0xff] }
 0xae2   : > { %v2433_v38 = vpack.c.bf16 %v2423_v35, %v2423_v35  ;;  %v2426_v39 = vadd.f32 %v3318_v22, %v2425_v37  ;;  %v3622_v40 = vpop.f32.mrb[55].mxu0  ;;  %v3778_v22 = vld [vmem:[#allocation2] sm:$0xff] }
 0xae4   : > { %v2557_v41 = vsel %vm1162_vm4, %v2433_v38, 0  ;;  %v2434_v42 = vpack.c.bf16 %v2426_v39, %v2426_v39 }
 0xae6   : > { %v2603_v43 = vsel %vm1162_vm4, %v2434_v42, 0 }
 0xba5   : > { %v2222_v14 = vpop.f32.mrb[44].mxu1 }
 0xba6   : > { %v4255_v15 = vadd.f32 %v2222_v14, %v4198_v60  ;;  %v3597_v16 = vpop.f32.mrb[45].mxu1  ;;  %v2652_v14 = vsel %vm1162_vm4, %v3326_v8, 0  ;;  %v3737_v8 = vld [vmem:[%s4017_s8 + $0x18] sm:$0xff]  }
 0xba7   : > { %v2225_v18 = vpop.f32.mrb[46].mxu1 }
 0xba8   : > { %v4258_v19 = vadd.f32 %v2225_v18, %v4200_v63  ;;  %v3598_v20 = vpop.f32.mrb[47].mxu1  ;;  %v2429_v63 = vpack.c.bf16 %v2291_v32, %v2291_v32 }
 0xbad   : > { %v2356_v9 = vpop.f32.mrb[48].mxu1 }
 0xbae   : > { %v2357_v24 = vadd.f32 %v3309_v23, %v2356_v9  ;;  %v3613_v25 = vpop.f32.mrb[49].mxu1 }
 0xbaf   : > { %v2359_v26 = vpop.f32.mrb[50].mxu1 }
 0xbb0   : > { %v2431_v28 = vpack.c.bf16 %v2357_v24, %v2357_v24  ;;  %v2360_v29 = vadd.f32 %v3309_v23, %v2359_v26  ;;  %v3614_v30 = vpop.f32.mrb[51].mxu1 }
 0xbb2   : > { %v2439_v31 = vsel %vm1040_vm3, %v2431_v28, 0  ;;  %v2432_v60 = vpack.c.bf16 %v2360_v29, %v2360_v29  ;;  %v3328_v29 = vld [vmem:[%s4442_s1] ss:$0 sm:$0xff] }
 0xbb3   : > { %3624 = vmatpush3.bf16.xpose.msra.mxu1 %v2439_v31 }
 0xbb4   : > { %v2485_v33 = vsel %vm1040_vm3, %v2432_v60, 0  ;;  %3635 = vmatprep.subr.bf16.mxu1 %v3834_v3 }
 0xbb5   : > { %3630 = vmatpush3.bf16.xpose.msra.mxu0 %v2485_v33 }
 0xbb6   : > { %3641 = vmatprep.subr.bf16.mxu0 %v3834_v3 }
 0xbba   : > { %3626 = vmatmul.mubr.msk.bf16.vlgmr.msra.gmra.mrb[52].mxu1 %vm1040_vm3, %v2429_v63 }
 0xbbb   : > { %3637 = vmatprep.mubr.msk.bf16.mxu1 %vm3835_vm1, %v3834_v3  ;;  %3636 = vmatpush3.bf16.msra.mxu1 %v2557_v41 }
 0xbbc   : > { %3632 = vmatmul.mubr.msk.bf16.vlgmr.msra.gmra.mrb[56].mxu0 %vm1040_vm3, %v2430_v21  ;;  %3647 = vmatprep.subr.bf16.mxu1 %v3834_v3 }
 0xbbd   : > { %3643 = vmatprep.mubr.msk.bf16.mxu0 %vm3835_vm1, %v3834_v3  ;;  %3642 = vmatpush3.bf16.msra.mxu0 %v2603_v43 }
 0xbbe   : > { %3653 = vmatprep.subr.bf16.mxu0 %v3834_v3 }
 0xc8d   : > { %v2475_v44 = vpop.f32.mrb[52].mxu1 }
 0xc8e   : > { %v2527_v45 = vmul.f32 0.35355338, %v2475_v44  ;;  %v3627_v46 = vpop.f32.mrb[53].mxu1 }
 0xc8f   : > { %v2478_v47 = vpop.f32.mrb[54].mxu1  ;;  %v2521_v48 = vpop.f32.mrb[56].mxu0 }
 0xc90   : > { %v2528_v49 = vmul.f32 0.35355338, %v2521_v48  ;;  %v3628_v50 = vpop.f32.mrb[55].mxu1  ;;  %v3633_v51 = vpop.f32.mrb[57].mxu0  ;;  %v2529_v52 = vsel %vm1040_vm3, %v2527_v45, -inf  ;;  %v3732_v47 = vld [vmem:[%s4007_s6] sm:$0xff]  }
 0xc91   : > { %2530 = vmax.xlane.f32.xlu0 %v2529_v52  ;;  %v2524_v53 = vpop.f32.mrb[58].mxu0  ;;  %v3733_v48 = vld [vmem:[%s4007_s6 + $0x8] sm:$0xff]  }
 0xc92   : > { %v3634_v54 = vpop.f32.mrb[59].mxu0  ;;  %v2532_v55 = vsel %vm1040_vm3, %v2528_v49, -inf  ;;  %v3735_v50 = vld [vmem:[%s4017_s8 + $0x8] sm:$0xff]  }
 0xc93   : > { %2533 = vmax.xlane.f32.xlu1 %v2532_v55 }
 0xd1e   : > { %v2531_v56 = vpop.xlane.xlu0 %2530 }
 0xd1f   : > { %v2535_v57 = vsub.f32 %v2527_v45, %v2531_v56 }
 0xd20   : > { %v2534_v58 = vpop.xlane.xlu1 %2533 }
 0xd21   : > { %v2537_v59 = vmul.f32 1.442695, %v2535_v57  ;;  %v2536_v61 = vsub.f32 %v2528_v49, %v2534_v58  ;;  %v3734_v49 = vld [vmem:[%s4017_s8] sm:$0xff]  }
 0xd22   : > { %v3329_v58 = vld [vmem:[%s4443_s4] ss:$0 sm:$0xff] }
 0xd23   : > { %3762 = vpow2.f32 %v2537_v59  ;;  %v2539_v62 = vmul.f32 1.442695, %v2536_v61 }
 0xd25   : > { %3764 = vpow2.f32 %v2539_v62 }
 0xd2d   : > { %v3763_v0 = vpop.eup %3762 }
 0xd2e   : > { %v2541_v1 = vsel %vm1040_vm3, %v3763_v0, 0.0 }
 0xd2f   : > { %v3765_v2 = vpop.eup %3764  ;;  %2542 = vadd.xlane.f32.xlu0 %v2541_v1  ;;  %v3330_v1 = vld [vmem:[%s4444_s20] ss:$0 sm:$0xff] }
 0xd30   : > { %v2544_v4 = vsel %vm1040_vm3, %v3765_v2, 0.0 }
 0xd31   : > { %2545 = vadd.xlane.f32.xlu1 %v2544_v4 }
 0xdbc   : > { %v2543_v5 = vpop.xlane.xlu0 %2542 }
 0xdbd   : > { %3766 = vrcp.f32 %v2543_v5 }
 0xdbe   : > { %v2546_v6 = vpop.xlane.xlu1 %2545 }
 0xdbf   : > { %3768 = vrcp.f32 %v2546_v6 }
 0xdc7   : > { %v3767_v7 = vpop.eup %3766 }
 0xdc8   : > { %v2549_v10 = vmul.f32 %v3767_v7, %v3763_v0  ;;  %v3736_v7 = vld [vmem:[%s4017_s8 + $0x10] sm:$0xff]   ;;  %s4446_s8 = sld [smem:[#allocation7_spill]] }
 0xdc9   : > { %v3769_v11 = vpop.eup %3768 }
 0xdca   : > { %v2550_v12 = vmul.f32 %v3769_v11, %v3765_v2  ;;  %v2551_v13 = vpack.c.bf16 %v2549_v10, %v2549_v10  ;;  %v3331_v10 = vld [vmem:[%s4445_s28] ss:$0 sm:$0xff] }
 0xdcc   : > { %3638 = vmatmul.mubr.msk.bf16.vlgmr.msra.gmra.mrb[56].mxu1 %vm1040_vm3, %v2551_v13  ;;  %v2552_v16 = vpack.c.bf16 %v2550_v12, %v2550_v12 }
 0xdcd   : > { %3648 = vmatpush3.bf16.msra.mxu1 %v2652_v14  ;;  %3649 = vmatprep.mubr.msk.bf16.mxu1 %vm3835_vm1, %v3834_v3 }
 0xdce   : > { %3644 = vmatmul.mubr.msk.bf16.vlgmr.msra.gmra.mrb[60].mxu0 %vm1040_vm3, %v2552_v16  ;;  %3661 = vmatprep.subr.bf16.mxu1 %v3834_v3  ;;  %s4447_s1 = sadd.s32 4294967295, %s4446_s8  }
 0xdcf   : > { %3657 = vmatprep.mubr.msk.bf16.mxu0 %vm3835_vm1, %v3834_v3  ;;  %3654 = vmatpush3.bf16.msra.mxu0 %v3732_v47  ;;  %v3342_v47 = vld [vmem:[%s822_s18] ss:$0 sm:$0xff]  ;;  %p4351_p6 = scmp.eq.s32.totalorder %s4447_s1, 1 }
 0xdd0   : > { %3655 = vmatprep.subr.bf16.mxu0 %v3834_v3 }
 0xdd1   : > { %p3782_p8 = pnand %p3781_p7, %p4351_p6 }
 0xdd3   : > { %3656 = vmatpush3.bf16.msra.mxu0 %v3733_v48  ;;  %p3783_p9 = pneg %p3782_p8 }
 0xdd5   : > { %p3790_p13 = pnand %p3789_p12, %p3783_p9 }
 0xe9f   : > { %v2593_v18 = vpop.f32.mrb[56].mxu1 }
 0xea0   : > { %v3639_v20 = vpop.f32.mrb[57].mxu1 }
 0xea1   : > { %v2596_v23 = vpop.f32.mrb[58].mxu1  ;;  %v2639_v9 = vpop.f32.mrb[60].mxu0 }
 0xea2   : > { %v2645_v24 = vpack.c.bf16 %v2639_v9, %v2593_v18  ;;  %v3640_v25 = vpop.f32.mrb[59].mxu1  ;;  %v3645_v26 = vpop.f32.mrb[61].mxu0 }
 0xea3   : > { %v2642_v27 = vpop.f32.mrb[62].mxu0 }
 0xea4   : > { %v3646_v28 = vpop.f32.mrb[63].mxu0  ;;  %3650 = vmatmul.mubr.msk.bf16.vlgmr.msra.gmra.mrb[60].mxu1 %vm1040_vm3, %v2645_v24 }
 0xea5   : > { %3669 = vmatprep.mubr.msk.bf16.mxu1 %vm3835_vm1, %v3834_v3  ;;  %3662 = vmatpush3.bf16.msra.mxu1 %v3734_v49 }
 0xea6   : > { %3663 = vmatprep.subr.bf16.mxu1 %v3834_v3 }
 0xea9   : > { %3664 = vmatpush3.bf16.msra.mxu1 %v3735_v50 }
 0xeaa   : > { %3665 = vmatprep.subr.bf16.mxu1 %v3834_v3 }
 0xead   : > { %3666 = vmatpush3.bf16.msra.mxu1 %v3736_v7 }
 0xeae   : > { %3667 = vmatprep.subr.bf16.mxu1 %v3834_v3  ;;  %v3335_v3 = vld [vmem:[%s816_s5] ss:$0 sm:$0xff] }
 0xeb1   : > { %3668 = vmatpush3.bf16.msra.mxu1 %v3737_v8 }
 0xf77   : > { %v2688_v30 = vpop.f32.mrb[60].mxu1 }
 0xf78   : > { %v2695_v31 = vadd.f32 %v2688_v30, %v4255_v15  ;;  %v3651_v60 = vpop.f32.mrb[61].mxu1 }
 0xf79   : > { %v2691_v32 = vpop.f32.mrb[62].mxu1 }
 0xf7a   : > { %v2703_v33 = vadd.f32 %v3328_v29, %v2695_v31  ;;  %v2696_v63 = vadd.f32 %v2691_v32, %v4258_v19  ;;  %v3652_v17 = vpop.f32.mrb[63].mxu1 }
 0xf7c   : > { %v2704_v21 = vadd.f32 %v3328_v29, %v2696_v63  ;;  %v2705_v34 = vadd.f32 %v3778_v22, %v2703_v33 }
 0xf7e   : > { %v2709_v35 = vsel %vm861_vm2, %v2705_v34, 0.0  ;;  %v2706_v37 = vadd.f32 %v3779_v36, %v2704_v21 }
 0xf7f   : > { %2710 = vadd.xlane.f32.xlu0 %v2709_v35 }
 0xf80   : > { %v2712_v38 = vsel %vm861_vm2, %v2706_v37, 0.0 }
 0xf81   : > { %2713 = vadd.xlane.f32.xlu1 %v2712_v38 }
0x100c   : > { %v2711_v15 = vpop.xlane.xlu0 %2710 }
0x100d   : > { %v2716_v39 = vmul.f32 0.03125, %v2711_v15 }
0x100e   : > { %v2714_v40 = vpop.xlane.xlu1 %2713 }
0x100f   : > { %v2718_v41 = vsub.f32 %v2705_v34, %v2716_v39  ;;  %v2717_v19 = vmul.f32 0.03125, %v2714_v40 }
0x1011   : > { %v2719_v42 = vsub.f32 %v2706_v37, %v2717_v19  ;;  %v2720_v43 = vmul.f32 %v2718_v41, %v2718_v41 }
0x1013   : > { %v2722_v44 = vsel %vm861_vm2, %v2720_v43, 0.0  ;;  %v2721_v45 = vmul.f32 %v2719_v42, %v2719_v42 }
0x1014   : > { %2723 = vadd.xlane.f32.xlu0 %v2722_v44  ;;  %v3341_v44 = vld [vmem:[%s819_s30] ss:$0 sm:$0xff] }
0x1015   : > { %v2725_v46 = vsel %vm861_vm2, %v2721_v45, 0.0 }
0x1016   : > { %2726 = vadd.xlane.f32.xlu1 %v2725_v46 }
0x10a1   : > { %v2724_v51 = vpop.xlane.xlu0 %2723 }
0x10a2   : > { %v2728_v52 = vmul.f32 0.03125, %v2724_v51 }
0x10a3   : > { %v2727_v53 = vpop.xlane.xlu1 %2726 }
0x10a4   : > { %v2730_v54 = vadd.f32 1e-05, %v2728_v52  ;;  %v2729_v55 = vmul.f32 0.03125, %v2727_v53 }
0x10a6   : > { %3770 = vrsqrt.f32 %v2730_v54  ;;  %v2731_v56 = vadd.f32 1e-05, %v2729_v55 }
0x10a8   : > { %3772 = vrsqrt.f32 %v2731_v56 }
0x10b0   : > { %v3771_v57 = vpop.eup %3770 }
0x10b1   : > { %v2734_v59 = vmul.f32 %v3771_v57, %v2718_v41 }
0x10b2   : > { %v3773_v61 = vpop.eup %3772 }
0x10b3   : > { %v2742_v62 = vmul.f32 %v3329_v58, %v2734_v59  ;;  %v2735_v0 = vmul.f32 %v3773_v61, %v2719_v42 }
0x10b5   : > { %v2743_v2 = vmul.f32 %v3329_v58, %v2735_v0  ;;  %v2750_v4 = vadd.f32 %v3330_v1, %v2742_v62 }
0x10b7   : > { %v2751_v5 = vadd.f32 %v3330_v1, %v2743_v2 }
0x10b9   : > { %v2752_v6 = vpack.c.bf16 %v2751_v5, %v2750_v4 }
0x10bb   : > { %3658 = vmatmul.mubr.msk.bf16.vlgmr.msra.gmra.mrb[64].mxu0 %vm861_vm2, %v2752_v6 }
0x118e   : > { %v2813_v11 = vpop.f32.mrb[64].mxu0 }
0x118f   : > { %v2814_v12 = vadd.f32 %v3331_v10, %v2813_v11  ;;  %v3659_v13 = vpop.f32.mrb[65].mxu0 }
0x1190   : > { %v2816_v14 = vpop.f32.mrb[66].mxu0 }
0x1191   : > { %v2817_v16 = vadd.f32 %v3331_v10, %v2816_v14  ;;  %v3660_v18 = vpop.f32.mrb[67].mxu0  ;;  %v2820_v20 = vmax.f32 %v2814_v12, 0.0 }
0x1193   : > { %v2821_v23 = vmax.f32 %v2817_v16, 0.0 }
0x1195   : > { %v2822_v9 = vpack.c.bf16 %v2821_v23, %v2820_v20 }
0x1197   : > { %3670 = vmatmul.mubr.msk.bf16.vlgmr.msra.gmra.mrb[64].mxu1 %vm2862_vm5, %v2822_v9 }
0x126a   : > { %v2900_v24 = vpop.f32.mrb[64].mxu1 }
0x126b   : > { %v2901_v25 = vadd.f32 %v3335_v3, %v2900_v24  ;;  %v3671_v26 = vpop.f32.mrb[65].mxu1 }
0x126c   : > { %v2903_v27 = vpop.f32.mrb[66].mxu1 }
0x126d   : > { %v2904_v28 = vadd.f32 %v3335_v3, %v2903_v27  ;;  %v3672_v29 = vpop.f32.mrb[67].mxu1  ;;  %v2907_v30 = vadd.f32 %v2901_v25, %v2750_v4 }
0x126f   : > { %v2911_v31 = vsel %vm861_vm2, %v2907_v30, 0.0  ;;  %v2908_v60 = vadd.f32 %v2904_v28, %v2751_v5 }
0x1270   : > { %2912 = vadd.xlane.f32.xlu0 %v2911_v31 }
0x1271   : > { %v2914_v32 = vsel %vm861_vm2, %v2908_v60, 0.0 }
0x1272   : > { %2915 = vadd.xlane.f32.xlu1 %v2914_v32 }
0x12fd   : > { %v2913_v33 = vpop.xlane.xlu0 %2912 }
0x12fe   : > { %v2917_v63 = vmul.f32 0.03125, %v2913_v33 }
0x12ff   : > { %v2916_v17 = vpop.xlane.xlu1 %2915 }
0x1300   : > { %v2919_v21 = vsub.f32 %v2907_v30, %v2917_v63  ;;  %v2918_v22 = vmul.f32 0.03125, %v2916_v17 }
0x1302   : > { %v2920_v34 = vsub.f32 %v2908_v60, %v2918_v22  ;;  %v2921_v35 = vmul.f32 %v2919_v21, %v2919_v21 }
0x1304   : > { %v2923_v36 = vsel %vm861_vm2, %v2921_v35, 0.0  ;;  %v2922_v37 = vmul.f32 %v2920_v34, %v2920_v34 }
0x1305   : > { %2924 = vadd.xlane.f32.xlu0 %v2923_v36 }
0x1306   : > { %v2926_v38 = vsel %vm861_vm2, %v2922_v37, 0.0 }
0x1307   : > { %2927 = vadd.xlane.f32.xlu1 %v2926_v38 }
0x1392   : > { %v2925_v15 = vpop.xlane.xlu0 %2924 }
0x1393   : > { %v2929_v39 = vmul.f32 0.03125, %v2925_v15 }
0x1394   : > { %v2928_v40 = vpop.xlane.xlu1 %2927 }
0x1395   : > { %v2931_v41 = vadd.f32 1e-05, %v2929_v39  ;;  %v2930_v19 = vmul.f32 0.03125, %v2928_v40 }
0x1397   : > { %3774 = vrsqrt.f32 %v2931_v41  ;;  %v2932_v42 = vadd.f32 1e-05, %v2930_v19 }
0x1399   : > { %3776 = vrsqrt.f32 %v2932_v42 }
0x13a1   : > { %v3775_v43 = vpop.eup %3774 }
0x13a2   : > { %v2935_v45 = vmul.f32 %v3775_v43, %v2919_v21 }
0x13a3   : > { %v3777_v46 = vpop.eup %3776 }
0x13a4   : > { %v2943_v48 = vmul.f32 %v3341_v44, %v2935_v45  ;;  %v2936_v49 = vmul.f32 %v3777_v46, %v2920_v34 }
0x13a6   : > { %v2944_v50 = vmul.f32 %v3341_v44, %v2936_v49  ;;  %v2951_v51 = vadd.f32 %v3342_v47, %v2943_v48 }
0x13a8   : > { %v2952_v52 = vadd.f32 %v3342_v47, %v2944_v50  ;;  %2953 = vst.msk [vmem:[#allocation2] sm:$0xff] %vm861_vm2, %v2951_v51 }
0x13aa   : > { %2954 = vst.msk [vmem:[#allocation2 + $0x8] sm:$0xff] %vm861_vm2, %v2952_v52 }
0x13ab   : > { %3793 = shalt.err (!%p3790_p13)
}
0x13ac   : > { %s4449_s17 = sld [smem:[#allocation20_spill]] }
0x13b2   : > { %s3794_s4 = scalar_lea.hbm %s4449_s17, 256 }
0x13b3   : > { %p3795_p0 = scmp.ne.s32.totalorder %s4449_s17, %s3794_s4  ;;  %p3800_p3 = scmp.lt.u32.totalorder %s3794_s4, %s4449_s17 }
0x13b5   : > { %p3796_p1 = pnand %p3795_p0, %p4351_p6 }
0x13b7   : > { %p3797_p2 = pneg %p3796_p1 }
0x13b9   : > { %p3802_p4 = pnand %p3800_p3, %p3797_p2 }
0x13bb   : > { %3805 = shalt.err (!%p3802_p4)
}
0x13bc   : > { %s3837_s27 = smov 128   ;;  %s3838_s28 = smov 8  }
0x13bd   : > { %3674 = dma.vmem_to_hbm [thread:$0]  (%p4351_p6), %s2965_s23, 256, %s4449_s17, [#allocation3], %s3837_s27, %s3837_s27, %s3838_s28  }
0x13be   : > { %3819 = dma.done.wait (%p4351_p6), [#allocation3], 256  }
0x13bf   : > { %3821 = vsyncadd (%p4351_p6), [#allocation3], 4294967040 }
0x13c0 PF: > { %s4450_s8 = sld [smem:[#allocation7_spill]]  ;;  %s4451_s24 = sld [smem:[#allocation6_spill]] }
0x13c1   : > { %s4452_s25 = sld [smem:[#allocation8_spill]] }
0x13c6   : > { %s28_s26 = sadd.s32 1, %s4450_s8  }
0x13c7   : > { %p25_p5 = scmp.ge.s32.totalorder %s28_s26, 4  }
0x13c9   :  { %27 = sbr.rel (!%p25_p5) target bundleno = 13 (0xd), region = 189 }
0x13d0   :  { %2980 = vsyncpa [#allocation3], 1 }
0x13d1   :  { %2982 = vsyncpa [#allocation3 + $0x1], 1 }

</bundles_post_ra>
